<compile_context>
chip_gen: v7x
topology: tpu7x:2x2x1
jax: 0.10.0
libtpu: 0.0.40
codegen_flags: <defaults>
</compile_context>

<pallas_src>
import functools

import jax
import jax.numpy as jnp
from jax.experimental import pallas as pl
from jax.experimental.pallas import tpu as pltpu


_VMEM = pl.BlockSpec(memory_space=pltpu.MemorySpace.VMEM)

# For output-row parity a (0=even, 1=odd) and macro-tap offset r in {0,1,2} into the
# 1-ring zero-padded input, the contributing ConvTranspose kernel row index is
# _PHASE_TAP[a][r] (-1 means: this parity has no tap at this offset).  The same
# table applies independently to columns.
_PHASE_TAP = ((4, 2, 0), (-1, 3, 1))


# ---------------------------------------------------------------------------
# Pallas kernels
# ---------------------------------------------------------------------------

def _linear_bn_relu_kernel(x_ref, w_ref, scale_ref, shift_ref, o_ref):
    """o = relu((x @ w) * scale + shift).  x:(N,K) bf16, w:(K,D) bf16, scale/shift:(1,D) f32."""
    y = jnp.dot(x_ref[...], w_ref[...], preferred_element_type=jnp.float32)
    y = jnp.maximum(y * scale_ref[...] + shift_ref[...], 0.0)
    o_ref[...] = y.astype(o_ref.dtype)


def _deconv_kernel(w_ref, cols_ref, scale_ref, shift_ref, o_ref, *, act):
    """Merged-phase ConvTranspose GEMM + fused BN affine + activation.

    w:           (4*Cout, 9*Cin)  bf16 packed sub-pixel weights
    cols:        (9*Cin,  M)      bf16 macro-tap slabs of the padded input, M = N*H*W
    scale/shift: (4*Cout, 1)      f32
    out:         (4*Cout, M)      lane-dense along M
    """
    acc = jnp.dot(w_ref[...], cols_ref[...], preferred_element_type=jnp.float32)
    y = acc * scale_ref[...] + shift_ref[...]
    if act == "relu":
        y = jnp.maximum(y, 0.0)
    else:  # "sigmoid"
        y = jax.nn.sigmoid(y)
    o_ref[...] = y.astype(o_ref.dtype)


# ---------------------------------------------------------------------------
# Wrappers (thin XLA glue around the Pallas calls)
# ---------------------------------------------------------------------------

def linear_bn_relu(x, w_t, scale, shift):
    """l1: Linear(no bias) -> BatchNorm1d (eval affine) -> ReLU.  Output bf16 (N, D)."""
    # Note: a (2,32)x(32,1024) GEMM is launch-overhead bound; it is kept as its own
    # call because the (N, D) -> (C, N, 4, 4) relayout between l1 and dc1 is plain
    # XLA glue rather than an in-kernel transpose.
    n, d = x.shape[0], w_t.shape[1]
    return pl.pallas_call(
        _linear_bn_relu_kernel,
        out_shape=jax.ShapeDtypeStruct((n, d), jnp.bfloat16),
        in_specs=[_VMEM] * 4,
        out_specs=_VMEM,
    )(x.astype(jnp.bfloat16), w_t, scale, shift)


def deconv_block(x_cnhw, w_cat, scale_cat, shift_cat, act, out_dtype):
    """ConvTranspose2d(Cin,Cout,5,stride=2,padding=2,output_padding=1) + affine + act.

    x_cnhw: (Cin, N, H, W) channel-first activation.  Returns (Cout, N, 2H, 2W).
    """
    cin, n, h, w = x_cnhw.shape
    cout = w_cat.shape[0] // 4
    m = n * h * w

    # 1-ring zero pad; the nine (r, c) macro-tap slabs of xp cover every live tap of
    # every output-pixel parity (no zero-dilated input, no 25x blow-up).
    xp = jnp.pad(x_cnhw, ((0, 0), (0, 0), (1, 1), (1, 1)))
    cols = jnp.concatenate(
        [xp[:, :, r:r + h, c:c + w].reshape(cin, m) for r in range(3) for c in range(3)],
        axis=0,
    ).astype(jnp.bfloat16)                                     # (9*Cin, M)

    out = pl.pallas_call(
        functools.partial(_deconv_kernel, act=act),
        out_shape=jax.ShapeDtypeStruct((4 * cout, m), out_dtype),
        in_specs=[_VMEM] * 4,
        out_specs=_VMEM,
    )(w_cat, cols, scale_cat, shift_cat)

    # (4*Cout, M) == (a, b, Cout, N, H, W) -> (Cout, N, 2H, 2W): interleave parities.
    y = out.reshape(2, 2, cout, n, h, w)
    y = jnp.transpose(y, (2, 3, 4, 0, 5, 1)).reshape(cout, n, 2 * h, 2 * w)
    return y


def generator_forward(x, p):
    """Mirrors GeneratorMNIST.forward.  x: (N, in_dim) -> (N, 1, 32, 32) NCHW."""
    n = x.shape[0]
    h = linear_bn_relu(x, p["l1_w_t"], p["l1_scale"], p["l1_shift"])     # (N, dim*64)
    c = h.shape[1] // 16                                                 # = dim*4
    h = jnp.transpose(h.reshape(n, c, 4, 4), (1, 0, 2, 3))               # (C, N, 4, 4)
    y = deconv_block(h, p["dc1_w"], p["dc1_scale"], p["dc1_shift"], "relu", jnp.bfloat16)
    y = deconv_block(y, p["dc2_w"], p["dc2_scale"], p["dc2_shift"], "relu", jnp.bfloat16)
    y = deconv_block(y, p["dc3_w"], p["dc3_scale"], p["dc3_shift"], "sigmoid", jnp.float32)
    return jnp.transpose(y, (1, 0, 2, 3))                                # (N, 1, 32, 32)


# ---------------------------------------------------------------------------
# Parameters: torch-layout raw params + one-time packing into kernel layouts
# ---------------------------------------------------------------------------

def _bn_affine(bn, eps=1e-5):
    scale = bn["gamma"] / jnp.sqrt(bn["var"] + eps)
    return scale, bn["beta"] - bn["mean"] * scale


def _pack_deconv_weight(w):
    """(Cin, Cout, 5, 5) torch ConvTranspose2d weight -> (4*Cout, 9*Cin) merged
    sub-pixel weight (rows: parity-major then Cout; cols: macro-tap-major then Cin)."""
    cin, cout = w.shape[0], w.shape[1]
    zero = jnp.zeros((cout, cin), jnp.float32)
    rows = []
    for a in range(2):
        for b in range(2):
            blocks = []
            for r in range(3):
                for c in range(3):
                    kh, kw = _PHASE_TAP[a][r], _PHASE_TAP[b][c]
                    blocks.append(zero if (kh < 0 or kw < 0) else w[:, :, kh, kw].T)
            rows.append(jnp.concatenate(blocks, axis=1))            # (Cout, 9*Cin)
    return jnp.concatenate(rows, axis=0).astype(jnp.bfloat16)       # (4*Cout, 9*Cin)


def init_raw_params(key, in_dim, dim):
    """Deterministic PyTorch-layout parameters (stand-ins for a trained module)."""
    ks = jax.random.split(key, 8)
    d = dim * 4 * 4 * 4

    def bn(k, c):
        k1, k2, k3, k4 = jax.random.split(k, 4)
        return {"gamma": 1.0 + 0.1 * jax.random.normal(k1, (c,), jnp.float32),
                "beta": 0.1 * jax.random.normal(k2, (c,), jnp.float32),
                "mean": 0.1 * jax.random.normal(k3, (c,), jnp.float32),
                "var": jnp.abs(1.0 + 0.1 * jax.random.normal(k4, (c,), jnp.float32))}

    return {
        "l1_w": 0.1 * jax.random.normal(ks[0], (d, in_dim), jnp.float32),          # (out, in)
        "l1_bn": bn(ks[1], d),
        "dc1_w": 0.1 * jax.random.normal(ks[2], (dim * 4, dim * 2, 5, 5), jnp.float32),
        "dc1_bn": bn(ks[3], dim * 2),
        "dc2_w": 0.1 * jax.random.normal(ks[4], (dim * 2, dim, 5, 5), jnp.float32),
        "dc2_bn": bn(ks[5], dim),
        "dc3_w": 0.1 * jax.random.normal(ks[6], (dim, 1, 5, 5), jnp.float32),
        "dc3_b": 0.1 * jax.random.normal(ks[7], (1,), jnp.float32),
    }


def prepare_params(raw):
    """One-time packing of weights into kernel-ready layouts (hoisted out of forward)."""
    d = raw["l1_w"].shape[0]
    l1_scale, l1_shift = _bn_affine(raw["l1_bn"])
    p = {
        "l1_w_t": raw["l1_w"].T.astype(jnp.bfloat16),   # (in_dim, d)
        "l1_scale": l1_scale.reshape(1, d),
        "l1_shift": l1_shift.reshape(1, d),
    }
    for name in ("dc1", "dc2"):
        cout = raw[name + "_w"].shape[1]
        scale, shift = _bn_affine(raw[name + "_bn"])
        p[name + "_w"] = _pack_deconv_weight(raw[name + "_w"])
        p[name + "_scale"] = jnp.tile(scale, 4).reshape(4 * cout, 1)
        p[name + "_shift"] = jnp.tile(shift, 4).reshape(4 * cout, 1)
    p["dc3_w"] = _pack_deconv_weight(raw["dc3_w"])      # (4, 9*dim)
    p["dc3_scale"] = jnp.ones((4, 1), jnp.float32)      # no BN after the last deconv
    p["dc3_shift"] = jnp.tile(raw["dc3_b"], 4).reshape(4, 1)
    return p


# ---------------------------------------------------------------------------
# Pure-JAX f32 reference (direct scatter ConvTranspose) for correctness checking
# ---------------------------------------------------------------------------

def _ref_deconv(x, w, bias=None, stride=2, pad=2, out_pad=1):
    n, cin, h, wd = x.shape
    cout, k = w.shape[1], w.shape[2]
    canvas = jnp.zeros((n, cout, (h - 1) * stride + k, (wd - 1) * stride + k), jnp.float32)
    contrib = jnp.einsum("nchw,cokl->nohwkl", x, w)
    for kh in range(k):
        for kw in range(k):
            canvas = canvas.at[:, :,
                               kh:kh + stride * (h - 1) + 1:stride,
                               kw:kw + stride * (wd - 1) + 1:stride].add(contrib[:, :, :, :, kh, kw])
    ho = (h - 1) * stride - 2 * pad + k + out_pad
    wo = (wd - 1) * stride - 2 * pad + k + out_pad
    y = canvas[:, :, pad:pad + ho, pad:pad + wo]
    if bias is not None:
        y = y + bias.reshape(1, -1, 1, 1)
    return y


def reference_forward(x, raw):
    s, b = _bn_affine(raw["l1_bn"])
    h = jnp.maximum((x @ raw["l1_w"].T) * s + b, 0.0)
    h = h.reshape(x.shape[0], -1, 4, 4)
    for name in ("dc1", "dc2"):
        h = _ref_deconv(h, raw[name + "_w"])
        s, b = _bn_affine(raw[name + "_bn"])
        h = jnp.maximum(h * s.reshape(1, -1, 1, 1) + b.reshape(1, -1, 1, 1), 0.0)
    h = _ref_deconv(h, raw["dc3_w"], raw["dc3_b"])
    return jax.nn.sigmoid(h)


# ---------------------------------------------------------------------------
# Main
# ---------------------------------------------------------------------------

if __name__ == "__main__":
    in_dim, dim, batch = 32, 16, 2  # small shapes consistent with GeneratorMNIST(in_dim, dim)

    key = jax.random.PRNGKey(0)
    k_x, k_p = jax.random.split(key)
    x = jax.random.normal(k_x, (batch, in_dim), jnp.float32)
    raw = init_raw_params(k_p, in_dim, dim)
    params = prepare_params(raw)

    fwd = jax.jit(generator_forward)
    out = jax.block_until_ready(fwd(x, params))

    assert out.shape == (batch, 1, 32, 32), out.shape
    assert bool(jnp.all(jnp.isfinite(out)))
    assert bool(jnp.all((out >= 0.0) & (out <= 1.0)))   # sigmoid output range

    ref = jax.block_until_ready(reference_forward(x, raw))
    max_err = float(jnp.max(jnp.abs(out - ref)))
    assert max_err < 2e-2, f"max abs error vs f32 reference: {max_err}"

    print("KERNEL_OK")
</pallas_src>

<mosaic_0001>
module attributes {stable_mosaic.version = 11 : i64} {
  func.func @_linear_bn_relu_kernel(%arg0: memref<2x32xbf16, #tpu.memory_space<vmem>>, %arg1: memref<32x1024xbf16, #tpu.memory_space<vmem>>, %arg2: memref<1x1024xf32, #tpu.memory_space<vmem>>, %arg3: memref<1x1024xf32, #tpu.memory_space<vmem>>, %arg4: memref<2x1024xbf16, #tpu.memory_space<vmem>>) attributes {dimension_semantics = [], scalar_prefetch = 0 : i64, scratch_operands = 0 : i64, tpu.core_type = #tpu.core_type<tc>} {
    %c0 = arith.constant 0 : index
    %c0_0 = arith.constant 0 : index
    %0 = vector.load %arg0[%c0, %c0_0] : memref<2x32xbf16, #tpu.memory_space<vmem>>, vector<2x32xbf16>
    %c0_1 = arith.constant 0 : index
    %c0_2 = arith.constant 0 : index
    %1 = vector.load %arg1[%c0_1, %c0_2] : memref<32x1024xbf16, #tpu.memory_space<vmem>>, vector<32x1024xbf16>
    %cst = arith.constant dense<0.000000e+00> : vector<2x1024xf32>
    %2 = tpu.matmul %0, %1, %cst {dimension_numbers = #tpu.dot_dimension_numbers<[1], [0], [0], [1], [0, 0, 1, 1], [], []>} : vector<2x32xbf16>, vector<32x1024xbf16>, vector<2x1024xf32> -> vector<2x1024xf32>
    %c0_3 = arith.constant 0 : index
    %c0_4 = arith.constant 0 : index
    %3 = vector.load %arg2[%c0_3, %c0_4] : memref<1x1024xf32, #tpu.memory_space<vmem>>, vector<1x1024xf32>
    %4 = vector.broadcast %3 : vector<1x1024xf32> to vector<2x1024xf32>
    %5 = arith.mulf %2, %4 : vector<2x1024xf32>
    %c0_5 = arith.constant 0 : index
    %c0_6 = arith.constant 0 : index
    %6 = vector.load %arg3[%c0_5, %c0_6] : memref<1x1024xf32, #tpu.memory_space<vmem>>, vector<1x1024xf32>
    %7 = vector.broadcast %6 : vector<1x1024xf32> to vector<2x1024xf32>
    %8 = arith.addf %5, %7 : vector<2x1024xf32>
    %cst_7 = arith.constant 0.000000e+00 : f32
    %9 = vector.broadcast %cst_7 : f32 to vector<2x1024xf32>
    %10 = arith.maximumf %8, %9 : vector<2x1024xf32>
    %11 = arith.truncf %10 : vector<2x1024xf32> to vector<2x1024xbf16>
    %c0_8 = arith.constant 0 : index
    %c0_9 = arith.constant 0 : index
    %12 = vector.load %arg4[%c0_8, %c0_9] : memref<2x1024xbf16, #tpu.memory_space<vmem>>, vector<2x1024xbf16>
    tpu.vector_store %arg4[%c0_8, %c0_9], %11 {strides = array<i32>} : memref<2x1024xbf16, #tpu.memory_space<vmem>>, vector<2x1024xbf16>,
    return
  }
}

module attributes {stable_mosaic.version = 11 : i64} {
  func.func @_deconv_kernel(%arg0: memref<128x576xbf16, #tpu.memory_space<vmem>>, %arg1: memref<576x32xbf16, #tpu.memory_space<vmem>>, %arg2: memref<128x1xf32, #tpu.memory_space<vmem>>, %arg3: memref<128x1xf32, #tpu.memory_space<vmem>>, %arg4: memref<128x32xbf16, #tpu.memory_space<vmem>>) attributes {dimension_semantics = [], scalar_prefetch = 0 : i64, scratch_operands = 0 : i64, tpu.core_type = #tpu.core_type<tc>} {
    %c0 = arith.constant 0 : index
    %c0_0 = arith.constant 0 : index
    %0 = vector.load %arg0[%c0, %c0_0] : memref<128x576xbf16, #tpu.memory_space<vmem>>, vector<128x576xbf16>
    %c0_1 = arith.constant 0 : index
    %c0_2 = arith.constant 0 : index
    %1 = vector.load %arg1[%c0_1, %c0_2] : memref<576x32xbf16, #tpu.memory_space<vmem>>, vector<576x32xbf16>
    %cst = arith.constant dense<0.000000e+00> : vector<128x32xf32>
    %2 = tpu.matmul %0, %1, %cst {dimension_numbers = #tpu.dot_dimension_numbers<[1], [0], [0], [1], [0, 0, 1, 1], [], []>} : vector<128x576xbf16>, vector<576x32xbf16>, vector<128x32xf32> -> vector<128x32xf32>
    %c0_3 = arith.constant 0 : index
    %c0_4 = arith.constant 0 : index
    %3 = vector.load %arg2[%c0_3, %c0_4] : memref<128x1xf32, #tpu.memory_space<vmem>>, vector<128x1xf32>
    %4 = vector.broadcast %3 : vector<128x1xf32> to vector<128x32xf32>
    %5 = arith.mulf %2, %4 : vector<128x32xf32>
    %c0_5 = arith.constant 0 : index
    %c0_6 = arith.constant 0 : index
    %6 = vector.load %arg3[%c0_5, %c0_6] : memref<128x1xf32, #tpu.memory_space<vmem>>, vector<128x1xf32>
    %7 = vector.broadcast %6 : vector<128x1xf32> to vector<128x32xf32>
    %8 = arith.addf %5, %7 : vector<128x32xf32>
    %cst_7 = arith.constant 0.000000e+00 : f32
    %9 = vector.broadcast %cst_7 : f32 to vector<128x32xf32>
    %10 = arith.maximumf %8, %9 : vector<128x32xf32>
    %11 = arith.truncf %10 : vector<128x32xf32> to vector<128x32xbf16>
    %c0_8 = arith.constant 0 : index
    %c0_9 = arith.constant 0 : index
    %12 = vector.load %arg4[%c0_8, %c0_9] : memref<128x32xbf16, #tpu.memory_space<vmem>>, vector<128x32xbf16>
    tpu.vector_store %arg4[%c0_8, %c0_9], %11 {strides = array<i32>} : memref<128x32xbf16, #tpu.memory_space<vmem>>, vector<128x32xbf16>,
    return
  }
}

module attributes {stable_mosaic.version = 11 : i64} {
  func.func @_deconv_kernel(%arg0: memref<64x288xbf16, #tpu.memory_space<vmem>>, %arg1: memref<288x128xbf16, #tpu.memory_space<vmem>>, %arg2: memref<64x1xf32, #tpu.memory_space<vmem>>, %arg3: memref<64x1xf32, #tpu.memory_space<vmem>>, %arg4: memref<64x128xbf16, #tpu.memory_space<vmem>>) attributes {dimension_semantics = [], scalar_prefetch = 0 : i64, scratch_operands = 0 : i64, tpu.core_type = #tpu.core_type<tc>} {
    %c0 = arith.constant 0 : index
    %c0_0 = arith.constant 0 : index
    %0 = vector.load %arg0[%c0, %c0_0] : memref<64x288xbf16, #tpu.memory_space<vmem>>, vector<64x288xbf16>
    %c0_1 = arith.constant 0 : index
    %c0_2 = arith.constant 0 : index
    %1 = vector.load %arg1[%c0_1, %c0_2] : memref<288x128xbf16, #tpu.memory_space<vmem>>, vector<288x128xbf16>
    %cst = arith.constant dense<0.000000e+00> : vector<64x128xf32>
    %2 = tpu.matmul %0, %1, %cst {dimension_numbers = #tpu.dot_dimension_numbers<[1], [0], [0], [1], [0, 0, 1, 1], [], []>} : vector<64x288xbf16>, vector<288x128xbf16>, vector<64x128xf32> -> vector<64x128xf32>
    %c0_3 = arith.constant 0 : index
    %c0_4 = arith.constant 0 : index
    %3 = vector.load %arg2[%c0_3, %c0_4] : memref<64x1xf32, #tpu.memory_space<vmem>>, vector<64x1xf32>
    %4 = vector.broadcast %3 : vector<64x1xf32> to vector<64x128xf32>
    %5 = arith.mulf %2, %4 : vector<64x128xf32>
    %c0_5 = arith.constant 0 : index
    %c0_6 = arith.constant 0 : index
    %6 = vector.load %arg3[%c0_5, %c0_6] : memref<64x1xf32, #tpu.memory_space<vmem>>, vector<64x1xf32>
    %7 = vector.broadcast %6 : vector<64x1xf32> to vector<64x128xf32>
    %8 = arith.addf %5, %7 : vector<64x128xf32>
    %cst_7 = arith.constant 0.000000e+00 : f32
    %9 = vector.broadcast %cst_7 : f32 to vector<64x128xf32>
    %10 = arith.maximumf %8, %9 : vector<64x128xf32>
    %11 = arith.truncf %10 : vector<64x128xf32> to vector<64x128xbf16>
    %c0_8 = arith.constant 0 : index
    %c0_9 = arith.constant 0 : index
    %12 = vector.load %arg4[%c0_8, %c0_9] : memref<64x128xbf16, #tpu.memory_space<vmem>>, vector<64x128xbf16>
    tpu.vector_store %arg4[%c0_8, %c0_9], %11 {strides = array<i32>} : memref<64x128xbf16, #tpu.memory_space<vmem>>, vector<64x128xbf16>,
    return
  }
}

module attributes {stable_mosaic.version = 11 : i64} {
  func.func @_deconv_kernel(%arg0: memref<4x144xbf16, #tpu.memory_space<vmem>>, %arg1: memref<144x512xbf16, #tpu.memory_space<vmem>>, %arg2: memref<4x1xf32, #tpu.memory_space<vmem>>, %arg3: memref<4x1xf32, #tpu.memory_space<vmem>>, %arg4: memref<4x512xf32, #tpu.memory_space<vmem>>) attributes {dimension_semantics = [], scalar_prefetch = 0 : i64, scratch_operands = 0 : i64, tpu.core_type = #tpu.core_type<tc>} {
    %c0 = arith.constant 0 : index
    %c0_0 = arith.constant 0 : index
    %0 = vector.load %arg0[%c0, %c0_0] : memref<4x144xbf16, #tpu.memory_space<vmem>>, vector<4x144xbf16>
    %c0_1 = arith.constant 0 : index
    %c0_2 = arith.constant 0 : index
    %1 = vector.load %arg1[%c0_1, %c0_2] : memref<144x512xbf16, #tpu.memory_space<vmem>>, vector<144x512xbf16>
    %cst = arith.constant dense<0.000000e+00> : vector<4x512xf32>
    %2 = tpu.matmul %0, %1, %cst {dimension_numbers = #tpu.dot_dimension_numbers<[1], [0], [0], [1], [0, 0, 1, 1], [], []>} : vector<4x144xbf16>, vector<144x512xbf16>, vector<4x512xf32> -> vector<4x512xf32>
    %c0_3 = arith.constant 0 : index
    %c0_4 = arith.constant 0 : index
    %3 = vector.load %arg2[%c0_3, %c0_4] : memref<4x1xf32, #tpu.memory_space<vmem>>, vector<4x1xf32>
    %4 = vector.broadcast %3 : vector<4x1xf32> to vector<4x512xf32>
    %5 = arith.mulf %2, %4 : vector<4x512xf32>
    %c0_5 = arith.constant 0 : index
    %c0_6 = arith.constant 0 : index
    %6 = vector.load %arg3[%c0_5, %c0_6] : memref<4x1xf32, #tpu.memory_space<vmem>>, vector<4x1xf32>
    %7 = vector.broadcast %6 : vector<4x1xf32> to vector<4x512xf32>
    %8 = arith.addf %5, %7 : vector<4x512xf32>
    %9 = arith.negf %8 : vector<4x512xf32>
    %10 = math.exp %9 : vector<4x512xf32>
    %cst_7 = arith.constant 1.000000e+00 : f32
    %11 = vector.broadcast %cst_7 : f32 to vector<4x512xf32>
    %12 = arith.addf %11, %10 : vector<4x512xf32>
    %13 = arith.divf %11, %12 : vector<4x512xf32>
    %c0_8 = arith.constant 0 : index
    %c0_9 = arith.constant 0 : index
    %14 = vector.load %arg4[%c0_8, %c0_9] : memref<4x512xf32, #tpu.memory_space<vmem>>, vector<4x512xf32>
    tpu.vector_store %arg4[%c0_8, %c0_9], %13 {strides = array<i32>} : memref<4x512xf32, #tpu.memory_space<vmem>>, vector<4x512xf32>,
    return
  }
}

</mosaic_0001>

<bundles_post_ra>
// kernel: generator_forward.4
= control target key start
LH: loop header
LB: loop body
LE: loop exit
PB: predicated region body
PF: predicated region fallthrough
CT: control target
= control target key end

     0   :  { %9 = vsyncpa [#allocation3], 0  ;;  %s530_s15 = smov [#allocation2]   ;;  %s588_s0 = inlined_call_operand.vmem [shape: bf16[2,32], index: 0, kind: input, shape index: {}]   ;;  %s589_s1 = inlined_call_operand.hbm [shape: bf16[32,1024], index: 1, kind: input, shape index: {}]   ;;  %s590_s2 = inlined_call_operand.vmem [shape: f32[1,1024], index: 2, kind: input, shape index: {}]   ;;  %s591_s3 = inlined_call_operand.vmem [shape: f32[1,1024], index: 3, kind: input, shape index: {}]   ;;  %s592_s4 = inlined_call_operand.vmem [shape: bf16[2,1024], index: 4, kind: output, shape index: {}]  }
   0x1   :  { %s17_s16 = sshll.u32 %s530_s15, 4  ;;  %s506_s19 = scalar_lea.hbm %s589_s1, 2048  ;;  %s18_s16 = int_to_ptr.vmem [resolvable:$true] %s17_s16 }
   0x2   :  { %p507_p0 = scmp.ne.s32.totalorder %s589_s1, %s506_s19  ;;  %p510_p1 = scmp.lt.u32.totalorder %s506_s19, %s589_s1 }
   0x4   :  { %p512_p2 = pnand %p510_p1, %p507_p0 }
   0x6   :  { %515 = shalt.err (!%p512_p2)
}
   0x7   :  { %s516_s24 = scalar_lea.vmem %s18_s16, 2048  ;;  %p521_p4 = scmp.lt.s32.totalorder %s18_s16, %s18_s16 }
   0x8   :  { %p517_p3 = scmp.ne.s32.totalorder %s18_s16, %s516_s24  ;;  %p522_p5 = scmp.lt.s32.totalorder %s516_s24, %s516_s24 }
   0xa   :  { %p523_p6 = por %p522_p5, %p521_p4 }
   0xc   :  { %p524_p7 = pnand %p523_p6, %p517_p3 }
   0xe   :  { %527 = shalt.err (!%p524_p7)
}
   0xf   :  { %s531_s25 = smov 512   ;;  %s532_s26 = smov 32  }
  0x10   :  { %23 = dma.hbm_to_vmem [thread:$0]  %s589_s1, 2048, %s18_s16, [#allocation3], %s531_s25, %s531_s25, %s532_s26  }
  0x11   :  { %528 = dma.done.wait [#allocation3], 2048  }
  0x12   :  { %529 = vsyncadd [#allocation3], 4294965248  ;;  %v533_v0 = vmov 0   ;;  %v33_v1 = vld [vmem:[#allocation2] sm:$0xff]  ;;  %v34_v3 = vld [vmem:[#allocation2 + $0x8] sm:$0xff]  ;;  %vm129_vm0 = vcmask 261120   ;;  %v299_v34 = vlaneseq }
  0x13   :  { %165 = vmatprep.mubr.bf16.mxu0 %v533_v0  ;;  %206 = vmatprep.mubr.bf16.mxu1 %v533_v0  ;;  %v37_v2 = vld [vmem:[#allocation2 + $0x20] sm:$0xff]  ;;  %v38_v5 = vld [vmem:[#allocation2 + $0x28] sm:$0xff]  ;;  %v35_v15 = vld [vmem:[#allocation2 + $0x10] sm:$0xff]  ;;  %v534_v45 = vmov 1966171168  }
  0x14   :  { %v478_v4 = vcombine.high %v33_v1, %v37_v2  ;;  %v477_v6 = vcombine.low %v33_v1, %v37_v2  ;;  %v41_v7 = vld [vmem:[#allocation2 + $0x40] sm:$0xff]  ;;  %v480_v9 = vcombine.high %v34_v3, %v38_v5  ;;  %v479_v10 = vcombine.low %v34_v3, %v38_v5  ;;  %v42_v12 = vld [vmem:[#allocation2 + $0x48] sm:$0xff]  ;;  %v39_v16 = vld [vmem:[#allocation2 + $0x30] sm:$0xff] }
  0x15   :  { %v45_v8 = vld [vmem:[#allocation2 + $0x60] sm:$0xff]  ;;  %v46_v13 = vld [vmem:[#allocation2 + $0x68] sm:$0xff]  ;;  %v36_v17 = vld [vmem:[#allocation2 + $0x18] sm:$0xff]  ;;  %v482_v21 = vcombine.high %v35_v15, %v39_v16  ;;  %v481_v28 = vcombine.low %v35_v15, %v39_v16  ;;  %v300_v35 = vshrl.u32 %v299_v34, 7  ;;  %v426_v46 = vunpack.c.l.s4 %v534_v45 }
  0x16   :  { %v486_v11 = vcombine.high %v41_v7, %v45_v8  ;;  %133 = vmatprep.subr.bf16.mxu0 %v478_v4  ;;  %v488_v14 = vcombine.high %v42_v12, %v46_v13  ;;  %174 = vmatprep.subr.bf16.mxu1 %v480_v9  ;;  %v485_v18 = vcombine.low %v41_v7, %v45_v8  ;;  %v40_v19 = vld [vmem:[#allocation2 + $0x38] sm:$0xff]  ;;  %v43_v23 = vld [vmem:[#allocation2 + $0x50] sm:$0xff]  ;;  %v32_v27 = vld [vmem:[%s588_s0] sm:$0x1] }
  0x17   :  { %134 = vmatpush1.bf16.msra.mxu0 %v477_v6  ;;  %175 = vmatpush1.bf16.msra.mxu1 %v479_v10  ;;  %v487_v20 = vcombine.low %v42_v12, %v46_v13  ;;  %v484_v22 = vcombine.high %v36_v17, %v40_v19  ;;  %v47_v24 = vld [vmem:[#allocation2 + $0x70] sm:$0xff]  ;;  %v44_v25 = vld [vmem:[#allocation2 + $0x58] sm:$0xff]  ;;  %v483_v29 = vcombine.low %v36_v17, %v40_v19  ;;  %v301_v36 = vsub.s32 0, %v300_v35  ;;  %v297_v37 = vld [vmem:[%s590_s2] sm:$0xff] }
  0x18   :  { %135 = vmatprep.subr.bf16.mxu0 %v486_v11  ;;  %176 = vmatprep.subr.bf16.mxu1 %v488_v14  ;;  %v48_v26 = vld [vmem:[#allocation2 + $0x78] sm:$0xff]  ;;  %v490_v30 = vcombine.high %v43_v23, %v47_v24  ;;  %v489_v32 = vcombine.low %v43_v23, %v47_v24  ;;  %v309_v38 = vsub.s32 2, %v300_v35  ;;  %v305_v39 = vsub.s32 1, %v300_v35  ;;  %v347_v41 = vld [vmem:[%s591_s3] sm:$0xff] }
  0x19   :  { %v492_v31 = vcombine.high %v44_v25, %v48_v26  ;;  %v491_v33 = vcombine.low %v44_v25, %v48_v26  ;;  %v313_v40 = vsub.s32 3, %v300_v35  ;;  %v302_v42 = vrot.slane %v297_v37, %v301_v36 }
  0x1a   :  { %v310_v43 = vrot.slane %v297_v37, %v309_v38  ;;  %v306_v44 = vrot.slane %v297_v37, %v305_v39  ;;  %v352_v47 = vrot.slane %v347_v41, %v301_v36  ;;  %v360_v50 = vrot.slane %v347_v41, %v309_v38 }
  0x1b   :  { %136 = vmatpush1.bf16.msra.mxu0 %v485_v18  ;;  %177 = vmatpush1.bf16.msra.mxu1 %v487_v20  ;;  %v314_v48 = vrot.slane %v297_v37, %v313_v40  ;;  %v356_v51 = vrot.slane %v347_v41, %v305_v39  ;;  %v364_v55 = vrot.slane %v347_v41, %v313_v40  ;;  %v317_v56 = vsub.s32 4, %v300_v35 }
  0x1c   :  { %215 = vmatprep.subr.bf16.mxu0 %v482_v21  ;;  %256 = vmatprep.subr.bf16.mxu1 %v484_v22  ;;  %v325_v57 = vsub.s32 6, %v300_v35  ;;  %v427_v60 = vunpack.c.0.s8 %v426_v46  ;;  %v321_v63 = vsub.s32 5, %v300_v35  ;;  %v329_v4 = vsub.s32 7, %v300_v35 }
  0x1d   :  { %v318_v10 = vrot.slane %v297_v37, %v317_v56  ;;  %v368_v17 = vrot.slane %v347_v41, %v317_v56 }
  0x1e   :  { %493 = vmatmul.mubr.msk.bf16.vlgmr.msra.gmra.mrb[0].mxu0 %vm129_vm0, %v32_v27  ;;  %494 = vmatmul.mubr.msk.bf16.vlgmr.msra.gmra.mrb[0].mxu1 %vm129_vm0, %v32_v27  ;;  %v326_v11 = vrot.slane %v297_v37, %v325_v57  ;;  %v430_v14 = vsub.s32 %v427_v60, %v300_v35  ;;  %v322_v15 = vrot.slane %v297_v37, %v321_v63 }
  0x1f   :  { %216 = vmatpush1.bf16.msra.mxu0 %v481_v28  ;;  %257 = vmatpush1.bf16.msra.mxu1 %v483_v29  ;;  %v330_v18 = vrot.slane %v297_v37, %v329_v4  ;;  %v376_v21 = vrot.slane %v347_v41, %v325_v57  ;;  %v372_v22 = vrot.slane %v347_v41, %v321_v63 }
  0x20   :  { %217 = vmatprep.subr.bf16.mxu0 %v490_v30  ;;  %258 = vmatprep.subr.bf16.mxu1 %v492_v31 }
  0x21   :  { %247 = vmatprep.mubr.bf16.mxu0 %v533_v0  ;;  %288 = vmatprep.mubr.bf16.mxu1 %v533_v0 }
  0x23   :  { %218 = vmatpush1.bf16.msra.mxu0 %v489_v32  ;;  %259 = vmatpush1.bf16.msra.mxu1 %v491_v33 }
  0x26   :  { %495 = vmatmul.mubr.msk.bf16.vlgmr.msra.gmra.mrb[4].mxu0 %vm129_vm0, %v32_v27  ;;  %496 = vmatmul.mubr.msk.bf16.vlgmr.msra.gmra.mrb[4].mxu1 %vm129_vm0, %v32_v27  ;;  %v380_v27 = vrot.slane %v347_v41, %v329_v4 }
  0xf1   :  { %v167_v49 = vpop.f32.mrb[0].mxu0  ;;  %v208_v53 = vpop.f32.mrb[0].mxu1 }
  0xf2   :  { %v339_v52 = vmul.f32 %v302_v42, %v167_v49  ;;  %v169_v54 = vpop.f32.mrb[1].mxu0  ;;  %v341_v58 = vmul.f32 %v310_v43, %v208_v53  ;;  %v210_v61 = vpop.f32.mrb[1].mxu1 }
  0xf3   :  { %v340_v59 = vmul.f32 %v306_v44, %v169_v54  ;;  %v171_v62 = vpop.f32.mrb[2].mxu0  ;;  %v342_v1 = vmul.f32 %v314_v48, %v210_v61  ;;  %v212_v2 = vpop.f32.mrb[2].mxu1 }
  0xf4   :  { %v389_v0 = vadd.f32 %v352_v47, %v339_v52  ;;  %v172_v3 = vpop.f32.mrb[3].mxu0  ;;  %v391_v5 = vadd.f32 %v360_v50, %v341_v58  ;;  %v213_v7 = vpop.f32.mrb[3].mxu1 }
  0xf5   :  { %v390_v6 = vadd.f32 %v356_v51, %v340_v59  ;;  %v392_v9 = vadd.f32 %v364_v55, %v342_v1 }
  0xf6   :  { %v397_v8 = vmax.f32 %v389_v0, 0.0  ;;  %v399_v12 = vmax.f32 %v391_v5, 0.0 }
  0xf7   :  { %v398_v13 = vmax.f32 %v390_v6, 0.0  ;;  %v400_v16 = vmax.f32 %v392_v9, 0.0 }
  0xf9   :  { %v497_v19 = vpack.c.bf16 %v398_v13, %v397_v8  ;;  %v249_v20 = vpop.f32.mrb[4].mxu0  ;;  %v498_v23 = vpack.c.bf16 %v400_v16, %v399_v12  ;;  %v290_v25 = vpop.f32.mrb[4].mxu1 }
  0xfa   :  { %v343_v24 = vmul.f32 %v318_v10, %v249_v20  ;;  %v251_v26 = vpop.f32.mrb[5].mxu0  ;;  %v345_v29 = vmul.f32 %v326_v11, %v290_v25  ;;  %v292_v31 = vpop.f32.mrb[5].mxu1 }
  0xfb   :  { %v431_v28 = vrot.slane %v497_v19, %v430_v14  ;;  %v344_v30 = vmul.f32 %v322_v15, %v251_v26  ;;  %v253_v32 = vpop.f32.mrb[6].mxu0  ;;  %v438_v33 = vrot.slane %v498_v23, %v430_v14  ;;  %v346_v35 = vmul.f32 %v330_v18, %v292_v31  ;;  %v294_v36 = vpop.f32.mrb[6].mxu1 }
  0xfc   :  { %v393_v34 = vadd.f32 %v368_v17, %v343_v24  ;;  %v254_v38 = vpop.f32.mrb[7].mxu0  ;;  %v395_v37 = vadd.f32 %v376_v21, %v345_v29  ;;  %v295_v40 = vpop.f32.mrb[7].mxu1 }
  0xfd   :  { %v394_v39 = vadd.f32 %v372_v22, %v344_v30  ;;  %v453_v42 = vcombine.low %v431_v28, %v438_v33  ;;  %v396_v44 = vadd.f32 %v380_v27, %v346_v35 }
  0xfe   :  { %v401_v43 = vmax.f32 %v393_v34, 0.0  ;;  %v403_v45 = vmax.f32 %v395_v37, 0.0 }
  0xff   :  { %v402_v46 = vmax.f32 %v394_v39, 0.0  ;;  %v404_v47 = vmax.f32 %v396_v44, 0.0  ;;  %v461_v52 = vrot.slane %v453_v42, %v430_v14 }
 0x101   :  { %v499_v41 = vpack.c.bf16 %v402_v46, %v401_v43  ;;  %v500_v48 = vpack.c.bf16 %v404_v47, %v403_v45 }
 0x103   :  { %v445_v49 = vrot.slane %v499_v41, %v430_v14  ;;  %v452_v50 = vrot.slane %v500_v48, %v430_v14 }
 0x105   :  { %v454_v51 = vcombine.low %v445_v49, %v452_v50 }
 0x107   :  { %v468_v53 = vrot.slane %v454_v51, %v430_v14 }
 0x109   :  { %v469_v54 = vcombine.low %v461_v52, %v468_v53 }
 0x10b   :  { %471 = vst [vmem:[%s592_s4] sm:$0xff] %v469_v54 }
 0x10c   :  { %476 = vsyncpa [#allocation3], 1 }

// kernel: generator_forward.5
= control target key start
LH: loop header
LB: loop body
LE: loop exit
PB: predicated region body
PF: predicated region fallthrough
CT: control target
= control target key end

     0   :  { %v1578_v1 = vmov 0   ;;  %vm554_vm0 = vcmask 523264   ;;  %vm1174_vm1 = vcmask 257024   ;;  %s2114_s1 = inlined_call_operand.vmem [shape: bf16[576,32], index: 1, kind: input, shape index: {}]   ;;  %s2115_s0 = inlined_call_operand.vmem [shape: bf16[128,576], index: 0, kind: input, shape index: {}]   ;;  %s2116_s2 = inlined_call_operand.vmem [shape: f32[128,1], index: 2, kind: input, shape index: {}]   ;;  %s2117_s3 = inlined_call_operand.vmem [shape: f32[128,1], index: 3, kind: input, shape index: {}]   ;;  %s2118_s4 = inlined_call_operand.vmem [shape: bf16[128,32], index: 4, kind: output, shape index: {}]  }
   0x1   :  { %v1486_v0 = vld [vmem:[%s2114_s1 + $0x40] sm:$0xff]   ;;  %1485 = vset.pattern.permute.xlu1 %v1578_v1  ;;  %1484 = vset.pattern.permute.xlu0 %v1578_v1  ;;  %v1490_v5 = vld [vmem:[%s2114_s1 + $0x48] sm:$0xff]   ;;  %v1494_v9 = vld [vmem:[%s2114_s1 + $0x50] sm:$0xff]  }
   0x2   :  { %v1487_v2 = vld [vmem:[%s2114_s1 + $0xc0] sm:$0xff]   ;;  %1311 = vmatprep.subr.bf16.mxu0 %v1486_v0  ;;  %v1491_v6 = vld [vmem:[%s2114_s1 + $0xc8] sm:$0xff]   ;;  %v1495_v10 = vld [vmem:[%s2114_s1 + $0xd0] sm:$0xff]  }
   0x3   :  { %v1488_v3 = vld [vmem:[%s2114_s1] sm:$0xff]   ;;  %1375 = vmatprep.subr.bf16.mxu1 %v1487_v2  ;;  %v1492_v7 = vld [vmem:[%s2114_s1 + $0x8] sm:$0xff]   ;;  %v1496_v11 = vld [vmem:[%s2114_s1 + $0x10] sm:$0xff]  }
   0x4   :  { %v1489_v4 = vld [vmem:[%s2114_s1 + $0x80] sm:$0xff]   ;;  %1312 = vmatpush3.bf16.msra.mxu0 %v1488_v3  ;;  %v1493_v8 = vld [vmem:[%s2114_s1 + $0x88] sm:$0xff]   ;;  %v1497_v12 = vld [vmem:[%s2114_s1 + $0x90] sm:$0xff]  }
   0x5   :  { %1376 = vmatpush3.bf16.msra.mxu1 %v1489_v4  ;;  %1313 = vmatprep.subr.bf16.mxu0 %v1490_v5  ;;  %v1498_v13 = vld [vmem:[%s2114_s1 + $0x58] sm:$0xff]   ;;  %v1502_v17 = vld [vmem:[%s2114_s1 + $0x60] sm:$0xff]   ;;  %v1506_v21 = vld [vmem:[%s2114_s1 + $0x68] sm:$0xff]  }
   0x6   :  { %1377 = vmatprep.subr.bf16.mxu1 %v1491_v6  ;;  %v1499_v14 = vld [vmem:[%s2114_s1 + $0xd8] sm:$0xff]   ;;  %v1503_v18 = vld [vmem:[%s2114_s1 + $0xe0] sm:$0xff]   ;;  %v1507_v22 = vld [vmem:[%s2114_s1 + $0xe8] sm:$0xff]  }
   0x7   :  { %v1500_v15 = vld [vmem:[%s2114_s1 + $0x18] sm:$0xff]   ;;  %v1504_v19 = vld [vmem:[%s2114_s1 + $0x20] sm:$0xff]   ;;  %v1508_v23 = vld [vmem:[%s2114_s1 + $0x28] sm:$0xff]  }
   0x8   :  { %1314 = vmatpush3.bf16.msra.mxu0 %v1492_v7  ;;  %v1501_v16 = vld [vmem:[%s2114_s1 + $0x98] sm:$0xff]   ;;  %v1505_v20 = vld [vmem:[%s2114_s1 + $0xa0] sm:$0xff]   ;;  %v1509_v24 = vld [vmem:[%s2114_s1 + $0xa8] sm:$0xff]  }
   0x9   :  { %1378 = vmatpush3.bf16.msra.mxu1 %v1493_v8  ;;  %1315 = vmatprep.subr.bf16.mxu0 %v1494_v9  ;;  %v1510_v25 = vld [vmem:[%s2114_s1 + $0x70] sm:$0xff]   ;;  %v1514_v29 = vld [vmem:[%s2114_s1 + $0x78] sm:$0xff]   ;;  %v1523_v36 = vld [vmem:[%s2115_s0 + $0xc] ss:$20 sps:$4 sm:$0xff]  }
   0xa   :  { %1379 = vmatprep.subr.bf16.mxu1 %v1495_v10  ;;  %v1511_v26 = vld [vmem:[%s2114_s1 + $0xf0] sm:$0xff]   ;;  %v1515_v30 = vld [vmem:[%s2114_s1 + $0xf8] sm:$0xff]   ;;  %v1524_v37 = vld [vmem:[%s2114_s1 + $0x100] sm:$0xff]   ;;  %708 = vmatprep.mubr.bf16.mxu1 %v1523_v36 }
   0xb   :  { %v1512_v27 = vld [vmem:[%s2114_s1 + $0x30] sm:$0xff]   ;;  %v1516_v31 = vld [vmem:[%s2114_s1 + $0x38] sm:$0xff]   ;;  %v1525_v38 = vld [vmem:[%s2115_s0 + $0x2c] ss:$20 sps:$4 sm:$0xff]  }
   0xc   :  { %1316 = vmatpush3.bf16.msra.mxu0 %v1496_v11  ;;  %v1513_v28 = vld [vmem:[%s2114_s1 + $0xb0] sm:$0xff]   ;;  %v1517_v32 = vld [vmem:[%s2114_s1 + $0xb8] sm:$0xff]   ;;  %v1537_v43 = vld [vmem:[%s2114_s1 + $0x108] sm:$0xff]  }
   0xd   :  { %1380 = vmatpush3.bf16.msra.mxu1 %v1497_v12  ;;  %1317 = vmatprep.subr.bf16.mxu0 %v1498_v13  ;;  %v1518_v33 = vld [vmem:[%s2115_s0] ss:$20 sps:$4 sm:$0xff]   ;;  %v1520_v34 = vld [vmem:[%s2115_s0 + $0x4] ss:$20 sps:$4 sm:$0xff]   ;;  %v1521_v35 = vld [vmem:[%s2115_s0 + $0x8] ss:$20 sps:$4 sm:$0xff]  }
   0xe   :  { %1381 = vmatprep.subr.bf16.mxu1 %v1499_v14  ;;  %611 = vmatprep.mubr.bf16.mxu0 %v1520_v34  ;;  %v1527_v39 = vld [vmem:[%s2115_s0 + $0x34] ss:$20 sps:$4 sm:$0xff]   ;;  %v1530_v41 = vld [vmem:[%s2115_s0 + $0x30] ss:$20 sps:$4 sm:$0xff]   ;;  %v1536_v46 = vld [vmem:[%s2115_s0 + $0x58] ss:$20 sps:$4 sm:$0xff]  }
   0xf   :  { %v1529_v40 = vld [vmem:[%s2115_s0 + $0x28] ss:$20 sps:$4 sm:$0xff]   ;;  %v1535_v45 = vld [vmem:[%s2115_s0 + $0x50] ss:$20 sps:$4 sm:$0xff]   ;;  %v1542_v53 = vld [vmem:[%s2115_s0 + $0x78] ss:$20 sps:$4 sm:$0xff]  }
  0x10   :  { %1318 = vmatpush3.bf16.msra.mxu0 %v1500_v15  ;;  %v1531_v42 = vld [vmem:[%s2115_s0 + $0x54] ss:$20 sps:$4 sm:$0xff]   ;;  %v1533_v44 = vld [vmem:[%s2115_s0 + $0x5c] ss:$20 sps:$4 sm:$0xff]   ;;  %v1540_v49 = vld [vmem:[%s2115_s0 + $0x84] ss:$20 sps:$4 sm:$0xff]  }
  0x11   :  { %1382 = vmatpush3.bf16.msra.mxu1 %v1501_v16  ;;  %1319 = vmatprep.subr.bf16.mxu0 %v1502_v17  ;;  %v1550_v47 = vld [vmem:[%s2114_s1 + $0x110] sm:$0xff]   ;;  %v870_v51 = vld [vmem:[%s2116_s2] sm:$0xff]  ;;  %v873_v52 = vld [vmem:[%s2116_s2 + $0x18] sm:$0xff] }
  0x12   :  { %1383 = vmatprep.subr.bf16.mxu1 %v1503_v18  ;;  %v1538_v48 = vld [vmem:[%s2115_s0 + $0x7c] ss:$20 sps:$4 sm:$0xff]   ;;  %888 = vperm.xlu0 %1484, %v870_v51   ;;  %v871_v54 = vld [vmem:[%s2116_s2 + $0x8] sm:$0xff]  ;;  %v1543_v56 = vld [vmem:[%s2115_s0 + $0x80] ss:$20 sps:$4 sm:$0xff]  }
  0x13   :  { %v872_v50 = vld [vmem:[%s2116_s2 + $0x10] sm:$0xff]  ;;  %v1563_v55 = vld [vmem:[%s2114_s1 + $0x118] sm:$0xff]   ;;  %v875_v58 = vld [vmem:[%s2116_s2 + $0x28] sm:$0xff] }
  0x14   :  { %1320 = vmatpush3.bf16.msra.mxu0 %v1504_v19  ;;  %898 = vperm.xlu1 %1485, %v872_v50   ;;  %v1544_v57 = vld [vmem:[%s2115_s0 + $0xa4] ss:$20 sps:$4 sm:$0xff]   ;;  %v1546_v59 = vld [vmem:[%s2115_s0 + $0xac] ss:$20 sps:$4 sm:$0xff]   ;;  %v876_v62 = vld [vmem:[%s2116_s2 + $0x30] sm:$0xff] }
  0x15   :  { %1384 = vmatpush3.bf16.msra.mxu1 %v1505_v20  ;;  %1321 = vmatprep.subr.bf16.mxu0 %v1506_v21  ;;  %v874_v60 = vld [vmem:[%s2116_s2 + $0x20] sm:$0xff]  ;;  %v877_v61 = vld [vmem:[%s2116_s2 + $0x38] sm:$0xff]  ;;  %v879_v2 = vld [vmem:[%s2116_s2 + $0x48] sm:$0xff] }
  0x16   :  { %1385 = vmatprep.subr.bf16.mxu1 %v1507_v22  ;;  %893 = vperm.xlu0 %1484, %v871_v54   ;;  %v1548_v63 = vld [vmem:[%s2115_s0 + $0xa0] ss:$20 sps:$4 sm:$0xff]   ;;  %v1549_v0 = vld [vmem:[%s2115_s0 + $0xa8] ss:$20 sps:$4 sm:$0xff]   ;;  %v1556_v8 = vld [vmem:[%s2115_s0 + $0xd0] ss:$20 sps:$4 sm:$0xff]  }
  0x17   :  { %v1551_v1 = vld [vmem:[%s2115_s0 + $0xcc] ss:$20 sps:$4 sm:$0xff]   ;;  %v1553_v3 = vld [vmem:[%s2115_s0 + $0xd4] ss:$20 sps:$4 sm:$0xff]   ;;  %v881_v5 = vld [vmem:[%s2116_s2 + $0x58] sm:$0xff] }
  0x18   :  { %1322 = vmatpush3.bf16.msra.mxu0 %v1508_v23  ;;  %903 = vperm.xlu1 %1485, %v873_v52   ;;  %v878_v4 = vld [vmem:[%s2116_s2 + $0x40] sm:$0xff]  ;;  %v880_v6 = vld [vmem:[%s2116_s2 + $0x50] sm:$0xff]  ;;  %v1555_v7 = vld [vmem:[%s2115_s0 + $0xc8] ss:$20 sps:$4 sm:$0xff]  }
  0x19   :  { %1386 = vmatpush3.bf16.msra.mxu1 %v1509_v24  ;;  %1323 = vmatprep.subr.bf16.mxu0 %v1510_v25  ;;  %v1557_v9 = vld [vmem:[%s2115_s0 + $0xf4] ss:$20 sps:$4 sm:$0xff]   ;;  %v1559_v11 = vld [vmem:[%s2115_s0 + $0xfc] ss:$20 sps:$4 sm:$0xff]   ;;  %v882_v12 = vld [vmem:[%s2116_s2 + $0x60] sm:$0xff] }
  0x1a   :  { %1387 = vmatprep.subr.bf16.mxu1 %v1511_v26  ;;  %908 = vperm.xlu0 %1484, %v874_v60   ;;  %v883_v10 = vld [vmem:[%s2116_s2 + $0x68] sm:$0xff]  ;;  %v885_v13 = vld [vmem:[%s2116_s2 + $0x78] sm:$0xff]  ;;  %v884_v14 = vld [vmem:[%s2116_s2 + $0x70] sm:$0xff] }
  0x1b   :  { %v1561_v15 = vld [vmem:[%s2115_s0 + $0xf0] ss:$20 sps:$4 sm:$0xff]   ;;  %v1562_v16 = vld [vmem:[%s2115_s0 + $0xf8] ss:$20 sps:$4 sm:$0xff]   ;;  %v1569_v24 = vld [vmem:[%s2115_s0 + $0x120] ss:$20 sps:$4 sm:$0xff]  }
  0x1c   :  { %1324 = vmatpush3.bf16.msra.mxu0 %v1512_v27  ;;  %913 = vperm.xlu1 %1485, %v875_v58   ;;  %v1564_v17 = vld [vmem:[%s2115_s0 + $0x11c] ss:$20 sps:$4 sm:$0xff]   ;;  %v983_v18 = vld [vmem:[%s2117_s3 + $0x8] sm:$0xff]  ;;  %v1566_v19 = vld [vmem:[%s2115_s0 + $0x124] ss:$20 sps:$4 sm:$0xff]  }
  0x1d   :  { %1388 = vmatpush3.bf16.msra.mxu1 %v1513_v28  ;;  %1325 = vmatprep.subr.bf16.mxu0 %v1514_v29  ;;  %v982_v20 = vld [vmem:[%s2117_s3] sm:$0xff]  ;;  %v985_v21 = vld [vmem:[%s2117_s3 + $0x18] sm:$0xff]  ;;  %v984_v22 = vld [vmem:[%s2117_s3 + $0x10] sm:$0xff] }
  0x1e   :  { %1389 = vmatprep.subr.bf16.mxu1 %v1515_v30  ;;  %918 = vperm.xlu0 %1484, %v876_v62   ;;  %v1568_v23 = vld [vmem:[%s2115_s0 + $0x118] ss:$20 sps:$4 sm:$0xff]   ;;  %v1570_v25 = vld [vmem:[%s2115_s0 + $0x10] ss:$20 sps:$4 sm:$0xff]  }
  0x1f   :  { %v987_v26 = vld [vmem:[%s2117_s3 + $0x28] sm:$0xff]  ;;  %v1571_v27 = vld [vmem:[%s2115_s0 + $0xb0] ss:$20 sps:$4 sm:$0xff]   ;;  %v989_v29 = vld [vmem:[%s2117_s3 + $0x38] sm:$0xff] }
  0x20   :  { %1326 = vmatpush3.bf16.msra.mxu0 %v1516_v31  ;;  %923 = vperm.xlu1 %1485, %v877_v61   ;;  %v986_v28 = vld [vmem:[%s2117_s3 + $0x20] sm:$0xff]  ;;  %v988_v30 = vld [vmem:[%s2117_s3 + $0x30] sm:$0xff]  ;;  %v1572_v31 = vld [vmem:[%s2115_s0 + $0x38] ss:$20 sps:$4 sm:$0xff]  }
  0x21   :  { %1390 = vmatpush3.bf16.msra.mxu1 %v1517_v32  ;;  %1451 = vmatprep.subr.bf16.mxu0 %v1524_v37  ;;  %v1573_v32 = vld [vmem:[%s2115_s0 + $0xd8] ss:$20 sps:$4 sm:$0xff]   ;;  %v990_v36 = vld [vmem:[%s2117_s3 + $0x40] sm:$0xff] }
  0x22   :  { %1475 = vmatprep.subr.bf16.mxu1 %v1524_v37  ;;  %928 = vperm.xlu0 %1484, %v878_v4   ;;  %v991_v34 = vld [vmem:[%s2117_s3 + $0x48] sm:$0xff] }
  0x23   :  { %612 = vmatmul.mubr.bf16.vlgmr.msra.gmra.mrb[0].mxu0 %v1518_v33  ;;  %v1574_v33 = vld [vmem:[%s2115_s0 + $0x60] ss:$20 sps:$4 sm:$0xff]  }
  0x24   :  { %709 = vmatmul.mubr.bf16.vlgmr.msra.gmra.mrb[0].mxu1 %v1521_v35  ;;  %1452 = vmatpush3.bf16.msra.mxu0 %v1524_v37  ;;  %v1575_v35 = vld [vmem:[%s2115_s0 + $0x100] ss:$20 sps:$4 sm:$0xff]  }
  0x25   :  { %1479 = vmatpush3.bf16.msra.mxu1 %v1524_v37  ;;  %619 = vmatprep.mubr.bf16.mxu0 %v1525_v38  ;;  %v993_v37 = vld [vmem:[%s2117_s3 + $0x58] sm:$0xff]  ;;  %v992_v38 = vld [vmem:[%s2117_s3 + $0x50] sm:$0xff] }
  0x26   :  { %716 = vmatprep.mubr.bf16.mxu1 %v1527_v39  ;;  %1453 = vmatprep.subr.bf16.mxu0 %v1537_v43  ;;  %v1576_v39 = vld [vmem:[%s2115_s0 + $0x88] ss:$20 sps:$4 sm:$0xff]  }
  0x27   :  { %1476 = vmatprep.subr.bf16.mxu1 %v1537_v43  ;;  %933 = vperm.xlu1 %1485, %v879_v2  }
  0x28   :  { %1454 = vmatpush3.bf16.msra.mxu0 %v1537_v43  ;;  %938 = vperm.xlu0 %1484, %v880_v6  }
  0x29   :  { %1480 = vmatpush3.bf16.msra.mxu1 %v1537_v43  ;;  %1455 = vmatprep.subr.bf16.mxu0 %v1550_v47  ;;  %v997_v43 = vld [vmem:[%s2117_s3 + $0x78] sm:$0xff] }
  0x2a   :  { %1477 = vmatprep.subr.bf16.mxu1 %v1550_v47 }
  0x2b   :  { %620 = vmatmul.mubr.bf16.gmra.mrb[4].mxu0 %v1529_v40  ;;  %943 = vperm.xlu1 %1485, %v881_v5   ;;  %v1577_v40 = vld [vmem:[%s2115_s0 + $0x128] ss:$20 sps:$4 sm:$0xff]  }
  0x2c   :  { %717 = vmatmul.mubr.bf16.gmra.mrb[4].mxu1 %v1530_v41  ;;  %627 = vmatprep.mubr.bf16.mxu0 %v1531_v42  ;;  %v995_v41 = vld [vmem:[%s2117_s3 + $0x68] sm:$0xff]  ;;  %v994_v42 = vld [vmem:[%s2117_s3 + $0x60] sm:$0xff] }
  0x2d   :  { %724 = vmatprep.mubr.bf16.mxu1 %v1533_v44  ;;  %1456 = vmatpush3.bf16.msra.mxu0 %v1550_v47  ;;  %v996_v44 = vld [vmem:[%s2117_s3 + $0x70] sm:$0xff] }
  0x2e   :  { %1481 = vmatpush3.bf16.msra.mxu1 %v1550_v47  ;;  %1457 = vmatprep.subr.bf16.mxu0 %v1563_v55 }
  0x2f   :  { %1478 = vmatprep.subr.bf16.mxu1 %v1563_v55  ;;  %953 = vperm.xlu1 %1485, %v883_v10  }
  0x30   :  { %948 = vperm.xlu0 %1484, %v882_v12  }
  0x31   :  { %1458 = vmatpush3.bf16.msra.mxu0 %v1563_v55 }
  0x32   :  { %1482 = vmatpush3.bf16.msra.mxu1 %v1563_v55 }
  0x33   :  { %628 = vmatmul.mubr.bf16.gmra.mrb[8].mxu0 %v1535_v45  ;;  %963 = vperm.xlu1 %1485, %v885_v13  }
  0x34   :  { %725 = vmatmul.mubr.bf16.gmra.mrb[8].mxu1 %v1536_v46  ;;  %635 = vmatprep.mubr.bf16.mxu0 %v1538_v48 }
  0x35   :  { %732 = vmatprep.mubr.bf16.mxu1 %v1540_v49  ;;  %958 = vperm.xlu0 %1484, %v884_v14  }
  0x37   :  { %1005 = vperm.xlu1 %1485, %v983_v18  }
  0x39   :  { %1000 = vperm.xlu0 %1484, %v982_v20  }
  0x3b   :  { %636 = vmatmul.mubr.bf16.gmra.mrb[12].mxu0 %v1542_v53  ;;  %1015 = vperm.xlu1 %1485, %v985_v21  }
  0x3c   :  { %733 = vmatmul.mubr.bf16.gmra.mrb[12].mxu1 %v1543_v56  ;;  %643 = vmatprep.mubr.bf16.mxu0 %v1544_v57 }
  0x3d   :  { %740 = vmatprep.mubr.bf16.mxu1 %v1546_v59  ;;  %1010 = vperm.xlu0 %1484, %v984_v22  }
  0x3f   :  { %1025 = vperm.xlu1 %1485, %v987_v26  }
  0x41   :  { %1020 = vperm.xlu0 %1484, %v986_v28  }
  0x43   :  { %644 = vmatmul.mubr.bf16.gmra.mrb[16].mxu0 %v1548_v63  ;;  %1035 = vperm.xlu1 %1485, %v989_v29  }
  0x44   :  { %741 = vmatmul.mubr.bf16.gmra.mrb[16].mxu1 %v1549_v0  ;;  %651 = vmatprep.mubr.bf16.mxu0 %v1551_v1 }
  0x45   :  { %748 = vmatprep.mubr.bf16.mxu1 %v1553_v3  ;;  %1030 = vperm.xlu0 %1484, %v988_v30  }
  0x47   :  { %1045 = vperm.xlu1 %1485, %v991_v34  }
  0x49   :  { %1040 = vperm.xlu0 %1484, %v990_v36  }
  0x4b   :  { %652 = vmatmul.mubr.bf16.gmra.mrb[20].mxu0 %v1555_v7  ;;  %1055 = vperm.xlu1 %1485, %v993_v37  }
  0x4c   :  { %749 = vmatmul.mubr.bf16.gmra.mrb[20].mxu1 %v1556_v8  ;;  %659 = vmatprep.mubr.bf16.mxu0 %v1557_v9 }
  0x4d   :  { %756 = vmatprep.mubr.bf16.mxu1 %v1559_v11  ;;  %1050 = vperm.xlu0 %1484, %v992_v38  }
  0x4f   :  { %1065 = vperm.xlu1 %1485, %v995_v41  }
  0x51   :  { %1060 = vperm.xlu0 %1484, %v994_v42  }
  0x53   :  { %660 = vmatmul.mubr.bf16.gmra.mrb[24].mxu0 %v1561_v15  ;;  %1075 = vperm.xlu1 %1485, %v997_v43  }
  0x54   :  { %757 = vmatmul.mubr.bf16.gmra.mrb[24].mxu1 %v1562_v16  ;;  %667 = vmatprep.mubr.bf16.mxu0 %v1564_v17 }
  0x55   :  { %764 = vmatprep.mubr.bf16.mxu1 %v1566_v19  ;;  %1070 = vperm.xlu0 %1484, %v996_v44  }
  0x5b   :  { %668 = vmatmul.mubr.bf16.gmra.mrb[28].mxu0 %v1568_v23 }
  0x5c   :  { %765 = vmatmul.mubr.bf16.gmra.mrb[28].mxu1 %v1569_v24  ;;  %1459 = vmatprep.mubr.msk.bf16.mxu0 %vm554_vm0, %v1570_v25 }
  0x5d   :  { %1467 = vmatprep.mubr.msk.bf16.mxu1 %vm554_vm0, %v1571_v27 }
  0x63   :  { %1460 = vmatmul.mubr.msk.bf16.vlgmr.msra.gmra.mrb[32].mxu0 %vm554_vm0, %v1572_v31 }
  0x64   :  { %1468 = vmatmul.mubr.msk.bf16.vlgmr.msra.gmra.mrb[32].mxu1 %vm554_vm0, %v1573_v32  ;;  %1463 = vmatprep.mubr.msk.bf16.mxu0 %vm554_vm0, %v1574_v33 }
  0x65   :  { %1471 = vmatprep.mubr.msk.bf16.mxu1 %vm554_vm0, %v1575_v35 }
  0x6b   :  { %1464 = vmatmul.mubr.msk.bf16.gmra.mrb[36].mxu0 %vm554_vm0, %v1576_v39 }
  0x6c   :  { %1472 = vmatmul.mubr.msk.bf16.gmra.mrb[36].mxu1 %vm554_vm0, %v1577_v40 }
  0x91   :  { %v1938_v46 = vpop.permute.xlu0 %888 }
  0x93   :  { %v1936_v45 = vpop.permute.xlu1 %898 }
  0x95   :  { %v1942_v48 = vpop.permute.xlu0 %893 }
  0x97   :  { %v1940_v47 = vpop.permute.xlu1 %903 }
  0x99   :  { %v1946_v50 = vpop.permute.xlu0 %908 }
  0x9b   :  { %v1944_v49 = vpop.permute.xlu1 %913 }
  0x9d   :  { %v1950_v52 = vpop.permute.xlu0 %918 }
  0x9f   :  { %v1948_v51 = vpop.permute.xlu1 %923 }
  0xa1   :  { %v1954_v54 = vpop.permute.xlu0 %928 }
  0xa6   :  { %v1952_v53 = vpop.permute.xlu1 %933 }
  0xa7   :  { %v1958_v56 = vpop.permute.xlu0 %938 }
  0xaa   :  { %v1956_v55 = vpop.permute.xlu1 %943 }
  0xae   :  { %v1962_v6 = vpop.permute.xlu1 %953 }
  0xaf   :  { %v1966_v8 = vpop.permute.xlu0 %948 }
  0xb2   :  { %v1970_v22 = vpop.permute.xlu1 %963 }
  0xb4   :  { %v1974_v24 = vpop.permute.xlu0 %958 }
  0xb6   :  { %v1978_v38 = vpop.permute.xlu1 %1005 }
  0xb8   :  { %v1982_v40 = vpop.permute.xlu0 %1000 }
  0xf6   :  { %v1327_v57 = vpop.f32.mrb[0].mxu0 }
  0xf7   :  { %v1391_v58 = vpop.f32.mrb[0].mxu1  ;;  %v1328_v59 = vpop.f32.mrb[1].mxu0 }
  0xf8   :  { %v1329_v60 = vadd.f32 %v1328_v59, %v1327_v57  ;;  %v1392_v61 = vpop.f32.mrb[1].mxu1  ;;  %v1330_v62 = vpop.f32.mrb[2].mxu0 }
  0xf9   :  { %v1393_v63 = vadd.f32 %v1392_v61, %v1391_v58  ;;  %v1394_v0 = vpop.f32.mrb[2].mxu1  ;;  %v1331_v1 = vpop.f32.mrb[3].mxu0 }
  0xfa   :  { %v1332_v2 = vadd.f32 %v1331_v1, %v1330_v62  ;;  %v1395_v3 = vpop.f32.mrb[3].mxu1 }
  0xfb   :  { %v1396_v4 = vadd.f32 %v1395_v3, %v1394_v0  ;;  %v1960_v5 = vadd.f32 %v1393_v63, %v1329_v60 }
  0xfd   :  { %v1964_v7 = vadd.f32 %v1396_v4, %v1332_v2  ;;  %v1986_v2 = vpop.permute.xlu1 %1015  ;;  %v1990_v4 = vpop.permute.xlu0 %1010 }
  0xfe   :  { %v1333_v9 = vpop.f32.mrb[4].mxu0 }
  0xff   :  { %v1397_v10 = vpop.f32.mrb[4].mxu1  ;;  %v1334_v11 = vpop.f32.mrb[5].mxu0 }
 0x100   :  { %v1335_v12 = vadd.f32 %v1334_v11, %v1333_v9  ;;  %v1398_v13 = vpop.f32.mrb[5].mxu1  ;;  %v1336_v14 = vpop.f32.mrb[6].mxu0 }
 0x101   :  { %v1399_v15 = vadd.f32 %v1398_v13, %v1397_v10  ;;  %v1400_v16 = vpop.f32.mrb[6].mxu1  ;;  %v1337_v17 = vpop.f32.mrb[7].mxu0 }
 0x102   :  { %v1338_v18 = vadd.f32 %v1337_v17, %v1336_v14  ;;  %v1401_v19 = vpop.f32.mrb[7].mxu1 }
 0x103   :  { %v1402_v20 = vadd.f32 %v1401_v19, %v1400_v16  ;;  %v1968_v21 = vadd.f32 %v1399_v15, %v1335_v12 }
 0x105   :  { %v1972_v23 = vadd.f32 %v1402_v20, %v1338_v18 }
 0x106   :  { %v1339_v25 = vpop.f32.mrb[8].mxu0 }
 0x107   :  { %v1403_v26 = vpop.f32.mrb[8].mxu1  ;;  %v1340_v27 = vpop.f32.mrb[9].mxu0 }
 0x108   :  { %v1341_v28 = vadd.f32 %v1340_v27, %v1339_v25  ;;  %v1404_v29 = vpop.f32.mrb[9].mxu1  ;;  %v1342_v30 = vpop.f32.mrb[10].mxu0 }
 0x109   :  { %v1405_v31 = vadd.f32 %v1404_v29, %v1403_v26  ;;  %v1406_v32 = vpop.f32.mrb[10].mxu1  ;;  %v1343_v33 = vpop.f32.mrb[11].mxu0 }
 0x10a   :  { %v1344_v34 = vadd.f32 %v1343_v33, %v1342_v30  ;;  %v1407_v35 = vpop.f32.mrb[11].mxu1  ;;  %v1992_v26 = vpop.permute.xlu1 %1025 }
 0x10b   :  { %v1408_v36 = vadd.f32 %v1407_v35, %v1406_v32  ;;  %v1976_v37 = vadd.f32 %v1405_v31, %v1341_v28  ;;  %v1996_v28 = vpop.permute.xlu0 %1020 }
 0x10d   :  { %v1980_v39 = vadd.f32 %v1408_v36, %v1344_v34 }
 0x10e   :  { %v1345_v41 = vpop.f32.mrb[12].mxu0 }
 0x10f   :  { %v1409_v42 = vpop.f32.mrb[12].mxu1  ;;  %v1346_v43 = vpop.f32.mrb[13].mxu0 }
 0x110   :  { %v1347_v44 = vadd.f32 %v1346_v43, %v1345_v41  ;;  %v1410_v57 = vpop.f32.mrb[13].mxu1  ;;  %v1348_v58 = vpop.f32.mrb[14].mxu0 }
 0x111   :  { %v1411_v59 = vadd.f32 %v1410_v57, %v1409_v42  ;;  %v1412_v60 = vpop.f32.mrb[14].mxu1  ;;  %v1349_v61 = vpop.f32.mrb[15].mxu0 }
 0x112   :  { %v1350_v62 = vadd.f32 %v1349_v61, %v1348_v58  ;;  %v1413_v63 = vpop.f32.mrb[15].mxu1  ;;  %v1998_v58 = vpop.permute.xlu1 %1035 }
 0x113   :  { %v1414_v0 = vadd.f32 %v1413_v63, %v1412_v60  ;;  %v1984_v1 = vadd.f32 %v1411_v59, %v1347_v44  ;;  %v2000_v60 = vpop.permute.xlu0 %1030 }
 0x115   :  { %v1988_v3 = vadd.f32 %v1414_v0, %v1350_v62 }
 0x116   :  { %v1351_v9 = vpop.f32.mrb[16].mxu0 }
 0x117   :  { %v1415_v10 = vpop.f32.mrb[16].mxu1  ;;  %v1352_v11 = vpop.f32.mrb[17].mxu0 }
 0x118   :  { %v1353_v12 = vadd.f32 %v1352_v11, %v1351_v9  ;;  %v1416_v13 = vpop.f32.mrb[17].mxu1  ;;  %v1354_v14 = vpop.f32.mrb[18].mxu0 }
 0x119   :  { %v1417_v15 = vadd.f32 %v1416_v13, %v1415_v10  ;;  %v1418_v16 = vpop.f32.mrb[18].mxu1  ;;  %v1355_v17 = vpop.f32.mrb[19].mxu0 }
 0x11a   :  { %v1356_v18 = vadd.f32 %v1355_v17, %v1354_v14  ;;  %v1419_v19 = vpop.f32.mrb[19].mxu1 }
 0x11b   :  { %v1420_v20 = vadd.f32 %v1419_v19, %v1418_v16  ;;  %v743_v25 = vadd.f32 %v1417_v15, %v1353_v12 }
 0x11d   :  { %v1994_v27 = vadd.f32 %v1420_v20, %v1356_v18  ;;  %v1046_v18 = vpop.permute.xlu1 %1045  ;;  %v1041_v20 = vpop.permute.xlu0 %1040 }
 0x11e   :  { %v1357_v29 = vpop.f32.mrb[20].mxu0 }
 0x11f   :  { %v1421_v30 = vpop.f32.mrb[20].mxu1  ;;  %v1358_v31 = vpop.f32.mrb[21].mxu0 }
 0x120   :  { %v1359_v32 = vadd.f32 %v1358_v31, %v1357_v29  ;;  %v1422_v33 = vpop.f32.mrb[21].mxu1  ;;  %v1360_v34 = vpop.f32.mrb[22].mxu0 }
 0x121   :  { %v1423_v35 = vadd.f32 %v1422_v33, %v1421_v30  ;;  %v1424_v36 = vpop.f32.mrb[22].mxu1  ;;  %v1361_v41 = vpop.f32.mrb[23].mxu0 }
 0x122   :  { %v1362_v42 = vadd.f32 %v1361_v41, %v1360_v34  ;;  %v1425_v43 = vpop.f32.mrb[23].mxu1 }
 0x123   :  { %v1426_v44 = vadd.f32 %v1425_v43, %v1424_v36  ;;  %v751_v57 = vadd.f32 %v1423_v35, %v1359_v32 }
 0x125   :  { %v754_v59 = vadd.f32 %v1426_v44, %v1362_v42 }
 0x126   :  { %v1363_v61 = vpop.f32.mrb[24].mxu0 }
 0x127   :  { %v1427_v62 = vpop.f32.mrb[24].mxu1  ;;  %v1364_v63 = vpop.f32.mrb[25].mxu0 }
 0x128   :  { %v1365_v0 = vadd.f32 %v1364_v63, %v1363_v61  ;;  %v1428_v9 = vpop.f32.mrb[25].mxu1  ;;  %v1366_v10 = vpop.f32.mrb[26].mxu0 }
 0x129   :  { %v1429_v11 = vadd.f32 %v1428_v9, %v1427_v62  ;;  %v1430_v12 = vpop.f32.mrb[26].mxu1  ;;  %v1367_v13 = vpop.f32.mrb[27].mxu0 }
 0x12a   :  { %v1368_v14 = vadd.f32 %v1367_v13, %v1366_v10  ;;  %v1431_v15 = vpop.f32.mrb[27].mxu1  ;;  %v1056_v62 = vpop.permute.xlu1 %1055 }
 0x12b   :  { %v1432_v16 = vadd.f32 %v1431_v15, %v1430_v12  ;;  %v2002_v17 = vadd.f32 %v1429_v11, %v1365_v0  ;;  %v1051_v0 = vpop.permute.xlu0 %1050 }
 0x12d   :  { %v2004_v19 = vadd.f32 %v1432_v16, %v1368_v14 }
 0x12e   :  { %v1369_v29 = vpop.f32.mrb[28].mxu0 }
 0x12f   :  { %v1433_v30 = vpop.f32.mrb[28].mxu1  ;;  %v1370_v31 = vpop.f32.mrb[29].mxu0 }
 0x130   :  { %v1371_v32 = vadd.f32 %v1370_v31, %v1369_v29  ;;  %v1434_v33 = vpop.f32.mrb[29].mxu1  ;;  %v1372_v34 = vpop.f32.mrb[30].mxu0 }
 0x131   :  { %v1435_v35 = vadd.f32 %v1434_v33, %v1433_v30  ;;  %v1436_v36 = vpop.f32.mrb[30].mxu1  ;;  %v1373_v41 = vpop.f32.mrb[31].mxu0 }
 0x132   :  { %v1374_v42 = vadd.f32 %v1373_v41, %v1372_v34  ;;  %v1437_v43 = vpop.f32.mrb[31].mxu1 }
 0x133   :  { %v1438_v44 = vadd.f32 %v1437_v43, %v1436_v36  ;;  %v2006_v61 = vadd.f32 %v1435_v35, %v1371_v32 }
 0x135   :  { %v2008_v63 = vadd.f32 %v1438_v44, %v1374_v42 }
 0x136   :  { %v1461_v9 = vpop.f32.mrb[32].mxu0 }
 0x137   :  { %v816_v10 = vadd.f32 %v1461_v9, %v1968_v21  ;;  %v1469_v11 = vpop.f32.mrb[32].mxu1  ;;  %v807_v12 = vpop.f32.mrb[33].mxu0 }
 0x138   :  { %v848_v13 = vadd.f32 %v1469_v11, %v751_v57  ;;  %v808_v14 = vadd.f32 %v807_v12, %v1960_v5  ;;  %v839_v15 = vpop.f32.mrb[33].mxu1  ;;  %v1462_v16 = vpop.f32.mrb[34].mxu0 }
 0x139   :  { %v968_v29 = vmul.f32 %v1936_v45, %v816_v10  ;;  %v840_v30 = vadd.f32 %v839_v15, %v743_v25  ;;  %v819_v31 = vadd.f32 %v1462_v16, %v1972_v23  ;;  %v1470_v32 = vpop.f32.mrb[34].mxu1  ;;  %v810_v33 = vpop.f32.mrb[35].mxu0 }
 0x13a   :  { %v976_v34 = vmul.f32 %v1958_v56, %v848_v13  ;;  %v966_v35 = vmul.f32 %v1938_v46, %v808_v14  ;;  %v851_v21 = vadd.f32 %v1470_v32, %v754_v59  ;;  %v811_v36 = vadd.f32 %v810_v33, %v1964_v7  ;;  %v842_v57 = vpop.f32.mrb[35].mxu1  ;;  %v2024_v46 = vpop.permute.xlu1 %1065 }
 0x13b   :  { %v1080_v5 = vadd.f32 %v1990_v4, %v968_v29  ;;  %v974_v41 = vmul.f32 %v1954_v54, %v840_v30  ;;  %v969_v45 = vmul.f32 %v1940_v47, %v819_v31  ;;  %v843_v25 = vadd.f32 %v842_v57, %v1994_v27  ;;  %v1061_v54 = vpop.permute.xlu0 %1060 }
 0x13c   :  { %v1088_v42 = vadd.f32 %v1051_v0, %v976_v34  ;;  %v1078_v23 = vadd.f32 %v1982_v40, %v966_v35  ;;  %v977_v43 = vmul.f32 %v1956_v55, %v851_v21  ;;  %v967_v56 = vmul.f32 %v1942_v48, %v811_v36 }
 0x13d   :  { %v1096_v59 = vmax.f32 %v1080_v5, 0.0  ;;  %v1086_v7 = vadd.f32 %v1041_v20, %v974_v41  ;;  %v1081_v44 = vadd.f32 %v1986_v2, %v969_v45  ;;  %v975_v4 = vmul.f32 %v1952_v53, %v843_v25 }
 0x13e   :  { %v1104_v9 = vmax.f32 %v1088_v42, 0.0  ;;  %v1094_v47 = vmax.f32 %v1078_v23, 0.0  ;;  %v1089_v10 = vadd.f32 %v1056_v62, %v977_v43  ;;  %v1079_v27 = vadd.f32 %v1978_v38, %v967_v56  ;;  %v1465_v0 = vpop.f32.mrb[36].mxu0  ;;  %v1076_v23 = vpop.permute.xlu1 %1075 }
 0x13f   :  { %v1297_v40 = vpack.c.bf16 %v1096_v59, %v1096_v59  ;;  %v1102_v11 = vmax.f32 %v1086_v7, 0.0  ;;  %v1097_v55 = vmax.f32 %v1081_v44, 0.0  ;;  %v1087_v12 = vadd.f32 %v1046_v18, %v975_v4  ;;  %v1473_v48 = vpop.f32.mrb[36].mxu1  ;;  %v823_v13 = vpop.f32.mrb[37].mxu0 }
 0x140   :  { %v1305_v14 = vpack.c.bf16 %v1104_v9, %v1104_v9  ;;  %v1295_v15 = vpack.c.bf16 %v1094_v47, %v1094_v47  ;;  %v1105_v20 = vmax.f32 %v1089_v10, 0.0  ;;  %v1095_v16 = vmax.f32 %v1079_v27, 0.0  ;;  %v855_v2 = vpop.f32.mrb[37].mxu1  ;;  %v1466_v29 = vpop.f32.mrb[38].mxu0 }
 0x141   :  { %1177 = vst.msk [vmem:[%s2118_s4 + $0x8] sm:$0xf] %vm1174_vm1, %v1297_v40  ;;  %v1303_v53 = vpack.c.bf16 %v1102_v11, %v1102_v11  ;;  %v1298_v38 = vpack.c.bf16 %v1097_v55, %v1097_v55  ;;  %v1103_v62 = vmax.f32 %v1087_v12, 0.0  ;;  %v832_v30 = vadd.f32 %v1465_v0, %v1984_v1  ;;  %v1474_v31 = vpop.f32.mrb[38].mxu1  ;;  %v826_v18 = vpop.f32.mrb[39].mxu0 }
 0x142   :  { %1185 = vst.msk [vmem:[%s2118_s4 + $0x28] sm:$0xf] %vm1174_vm1, %v1305_v14  ;;  %1175 = vst.msk [vmem:[%s2118_s4] sm:$0xf] %vm1174_vm1, %v1295_v15  ;;  %v1306_v32 = vpack.c.bf16 %v1105_v20, %v1105_v20  ;;  %v1296_v33 = vpack.c.bf16 %v1095_v16, %v1095_v16  ;;  %v864_v34 = vadd.f32 %v1473_v48, %v2006_v61  ;;  %v858_v21 = vpop.f32.mrb[39].mxu1  ;;  %v1071_v41 = vpop.permute.xlu0 %1070 }
 0x143   :  { %v824_v35 = vadd.f32 %v823_v13, %v1976_v37  ;;  %1183 = vst.msk [vmem:[%s2118_s4 + $0x20] sm:$0xf] %vm1174_vm1, %v1303_v53  ;;  %1178 = vst.msk [vmem:[%s2118_s4 + $0xc] sm:$0xf] %vm1174_vm1, %v1298_v38  ;;  %v1304_v1 = vpack.c.bf16 %v1103_v62, %v1103_v62  ;;  %v972_v36 = vmul.f32 %v1950_v52, %v832_v30 }
 0x144   :  { %v856_v57 = vadd.f32 %v855_v2, %v2002_v17  ;;  %v835_v61 = vadd.f32 %v1466_v29, %v1988_v3  ;;  %1186 = vst.msk [vmem:[%s2118_s4 + $0x2c] sm:$0xf] %vm1174_vm1, %v1306_v32  ;;  %1176 = vst.msk [vmem:[%s2118_s4 + $0x4] sm:$0xf] %vm1174_vm1, %v1296_v33  ;;  %v980_v37 = vmul.f32 %v1974_v24, %v864_v34 }
 0x145   :  { %v970_v5 = vmul.f32 %v1946_v50, %v824_v35  ;;  %v867_v52 = vadd.f32 %v1474_v31, %v2008_v63  ;;  %v827_v17 = vadd.f32 %v826_v18, %v1980_v39  ;;  %1184 = vst.msk [vmem:[%s2118_s4 + $0x24] sm:$0xf] %vm1174_vm1, %v1304_v1  ;;  %v1084_v3 = vadd.f32 %v2000_v60, %v972_v36 }
 0x146   :  { %v978_v45 = vmul.f32 %v1966_v8, %v856_v57  ;;  %v973_v25 = vmul.f32 %v1948_v51, %v835_v61  ;;  %v859_v24 = vadd.f32 %v858_v21, %v2004_v19  ;;  %v1092_v42 = vadd.f32 %v1071_v41, %v980_v37 }
 0x147   :  { %v1082_v50 = vadd.f32 %v1996_v28, %v970_v5  ;;  %v981_v63 = vmul.f32 %v1970_v22, %v867_v52  ;;  %v971_v39 = vmul.f32 %v1944_v49, %v827_v17  ;;  %v1100_v43 = vmax.f32 %v1084_v3, 0.0 }
 0x148   :  { %v1090_v56 = vadd.f32 %v1061_v54, %v978_v45  ;;  %v1085_v59 = vadd.f32 %v1998_v58, %v973_v25  ;;  %v979_v60 = vmul.f32 %v1962_v6, %v859_v24  ;;  %v1108_v7 = vmax.f32 %v1092_v42, 0.0 }
 0x149   :  { %v1098_v8 = vmax.f32 %v1082_v50, 0.0  ;;  %v1093_v44 = vadd.f32 %v1076_v23, %v981_v63  ;;  %v1083_v51 = vadd.f32 %v1992_v26, %v971_v39  ;;  %v1301_v19 = vpack.c.bf16 %v1100_v43, %v1100_v43 }
 0x14a   :  { %v1106_v4 = vmax.f32 %v1090_v56, 0.0  ;;  %v1101_v9 = vmax.f32 %v1085_v59, 0.0  ;;  %v1091_v28 = vadd.f32 %v2024_v46, %v979_v60  ;;  %v1309_v22 = vpack.c.bf16 %v1108_v7, %v1108_v7 }
 0x14b   :  { %v1299_v47 = vpack.c.bf16 %v1098_v8, %v1098_v8  ;;  %v1109_v49 = vmax.f32 %v1093_v44, 0.0  ;;  %v1099_v10 = vmax.f32 %v1083_v51, 0.0  ;;  %1181 = vst.msk [vmem:[%s2118_s4 + $0x18] sm:$0xf] %vm1174_vm1, %v1301_v19 }
 0x14c   :  { %v1307_v6 = vpack.c.bf16 %v1106_v4, %v1106_v4  ;;  %v1302_v58 = vpack.c.bf16 %v1101_v9, %v1101_v9  ;;  %v1107_v54 = vmax.f32 %v1091_v28, 0.0  ;;  %1189 = vst.msk [vmem:[%s2118_s4 + $0x38] sm:$0xf] %vm1174_vm1, %v1309_v22 }
 0x14d   :  { %1179 = vst.msk [vmem:[%s2118_s4 + $0x10] sm:$0xf] %vm1174_vm1, %v1299_v47  ;;  %v1310_v26 = vpack.c.bf16 %v1109_v49, %v1109_v49  ;;  %v1300_v46 = vpack.c.bf16 %v1099_v10, %v1099_v10 }
 0x14e   :  { %1187 = vst.msk [vmem:[%s2118_s4 + $0x30] sm:$0xf] %vm1174_vm1, %v1307_v6  ;;  %1182 = vst.msk [vmem:[%s2118_s4 + $0x1c] sm:$0xf] %vm1174_vm1, %v1302_v58  ;;  %v1308_v27 = vpack.c.bf16 %v1107_v54, %v1107_v54 }
 0x14f   :  { %1190 = vst.msk [vmem:[%s2118_s4 + $0x3c] sm:$0xf] %vm1174_vm1, %v1310_v26  ;;  %1180 = vst.msk [vmem:[%s2118_s4 + $0x14] sm:$0xf] %vm1174_vm1, %v1300_v46 }
 0x150   :  { %1188 = vst.msk [vmem:[%s2118_s4 + $0x34] sm:$0xf] %vm1174_vm1, %v1308_v27 }

// kernel: generator_forward.6
= control target key start
LH: loop header
LB: loop body
LE: loop exit
PB: predicated region body
PF: predicated region fallthrough
CT: control target
= control target key end

     0   :  { %v729_v1 = vmov 0   ;;  %vm238_vm0 = vcmask 261120   ;;  %s918_s1 = inlined_call_operand.vmem [shape: bf16[288,128], index: 1, kind: input, shape index: {}]   ;;  %s919_s0 = inlined_call_operand.vmem [shape: bf16[64,288], index: 0, kind: input, shape index: {}]   ;;  %s920_s2 = inlined_call_operand.vmem [shape: f32[64,1], index: 2, kind: input, shape index: {}]   ;;  %s921_s3 = inlined_call_operand.vmem [shape: f32[64,1], index: 3, kind: input, shape index: {}]   ;;  %s922_s4 = inlined_call_operand.vmem [shape: bf16[64,128], index: 4, kind: output, shape index: {}]  }
   0x1   :  { %v695_v0 = vld [vmem:[%s918_s1 + $0x40] sm:$0xff]   ;;  %694 = vset.pattern.permute.xlu1 %v729_v1  ;;  %693 = vset.pattern.permute.xlu0 %v729_v1  ;;  %v697_v3 = vld [vmem:[%s918_s1 + $0x48] sm:$0xff]   ;;  %v699_v5 = vld [vmem:[%s918_s1 + $0x50] sm:$0xff]  }
   0x2   :  { %v696_v2 = vld [vmem:[%s918_s1] sm:$0xff]   ;;  %618 = vmatprep.subr.bf16.mxu0 %v695_v0  ;;  %676 = vmatprep.subr.bf16.mxu1 %v695_v0  ;;  %v698_v4 = vld [vmem:[%s918_s1 + $0x8] sm:$0xff]   ;;  %v700_v6 = vld [vmem:[%s918_s1 + $0x10] sm:$0xff]  }
   0x3   :  { %619 = vmatpush3.bf16.msra.mxu0 %v696_v2  ;;  %684 = vmatpush3.bf16.msra.mxu1 %v696_v2  ;;  %v701_v7 = vld [vmem:[%s918_s1 + $0x58] sm:$0xff]   ;;  %v703_v9 = vld [vmem:[%s918_s1 + $0x60] sm:$0xff]   ;;  %v705_v11 = vld [vmem:[%s918_s1 + $0x68] sm:$0xff]  }
   0x4   :  { %620 = vmatprep.subr.bf16.mxu0 %v697_v3  ;;  %677 = vmatprep.subr.bf16.mxu1 %v697_v3  ;;  %v702_v8 = vld [vmem:[%s918_s1 + $0x18] sm:$0xff]   ;;  %v704_v10 = vld [vmem:[%s918_s1 + $0x20] sm:$0xff]   ;;  %v706_v14 = vld [vmem:[%s918_s1 + $0x28] sm:$0xff]  }
   0x5   :  { %v713_v12 = vld [vmem:[%s919_s0 + $0x4] ss:$12 sps:$4 sm:$0xff]   ;;  %v716_v13 = vld [vmem:[%s919_s0 + $0x4c] ss:$12 sps:$4 sm:$0xff]   ;;  %v714_v23 = vld [vmem:[%s919_s0 + $0x48] ss:$12 sps:$4 sm:$0xff]  }
   0x6   :  { %v707_v15 = vld [vmem:[%s918_s1 + $0x70] sm:$0xff]   ;;  %283 = vmatprep.mubr.bf16.mxu0 %v713_v12  ;;  %307 = vmatprep.mubr.bf16.mxu1 %v716_v13  ;;  %v709_v17 = vld [vmem:[%s918_s1 + $0x78] sm:$0xff]   ;;  %v381_v20 = vld [vmem:[%s920_s2] sm:$0xff] }
   0x7   :  { %621 = vmatpush3.bf16.msra.mxu0 %v698_v4  ;;  %685 = vmatpush3.bf16.msra.mxu1 %v698_v4  ;;  %v708_v16 = vld [vmem:[%s918_s1 + $0x30] sm:$0xff]   ;;  %v710_v18 = vld [vmem:[%s918_s1 + $0x38] sm:$0xff]   ;;  %v717_v21 = vld [vmem:[%s918_s1 + $0x80] sm:$0xff]  }
   0x8   :  { %622 = vmatprep.subr.bf16.mxu0 %v699_v5  ;;  %678 = vmatprep.subr.bf16.mxu1 %v699_v5  ;;  %v383_v19 = vld [vmem:[%s920_s2 + $0x10] sm:$0xff]  ;;  %v711_v22 = vld [vmem:[%s919_s0] ss:$12 sps:$4 sm:$0xff]   ;;  %v384_v24 = vld [vmem:[%s920_s2 + $0x18] sm:$0xff] }
   0x9   :  { %401 = vperm.xlu1 %694, %v383_v19   ;;  %391 = vperm.xlu0 %693, %v381_v20   ;;  %v382_v25 = vld [vmem:[%s920_s2 + $0x8] sm:$0xff]  ;;  %v385_v30 = vld [vmem:[%s920_s2 + $0x20] sm:$0xff]  ;;  %v388_v33 = vld [vmem:[%s920_s2 + $0x38] sm:$0xff] }
   0xa   :  { %v719_v26 = vld [vmem:[%s919_s0 + $0x1c] ss:$12 sps:$4 sm:$0xff]   ;;  %v722_v31 = vld [vmem:[%s919_s0 + $0x18] ss:$12 sps:$4 sm:$0xff]   ;;  %v723_v32 = vld [vmem:[%s919_s0 + $0x20] ss:$12 sps:$4 sm:$0xff]  }
   0xb   :  { %623 = vmatpush3.bf16.msra.mxu0 %v700_v6  ;;  %686 = vmatpush3.bf16.msra.mxu1 %v700_v6  ;;  %v718_v27 = vld [vmem:[%s918_s1 + $0x88] sm:$0xff]   ;;  %v387_v34 = vld [vmem:[%s920_s2 + $0x30] sm:$0xff]  ;;  %v726_v36 = vld [vmem:[%s919_s0 + $0x38] ss:$12 sps:$4 sm:$0xff]  }
   0xc   :  { %624 = vmatprep.subr.bf16.mxu0 %v701_v7  ;;  %679 = vmatprep.subr.bf16.mxu1 %v701_v7  ;;  %v721_v28 = vld [vmem:[%s919_s0 + $0x8] ss:$12 sps:$4 sm:$0xff]   ;;  %v437_v38 = vld [vmem:[%s921_s3] sm:$0xff]  ;;  %v727_v39 = vld [vmem:[%s919_s0 + $0x30] ss:$12 sps:$4 sm:$0xff]  }
   0xd   :  { %406 = vperm.xlu1 %694, %v384_v24   ;;  %396 = vperm.xlu0 %693, %v382_v25   ;;  %v386_v29 = vld [vmem:[%s920_s2 + $0x28] sm:$0xff]  ;;  %v724_v35 = vld [vmem:[%s919_s0 + $0x34] ss:$12 sps:$4 sm:$0xff]   ;;  %v728_v40 = vld [vmem:[%s919_s0 + $0x50] ss:$12 sps:$4 sm:$0xff]  }
   0xe   :  { %v438_v37 = vld [vmem:[%s921_s3 + $0x8] sm:$0xff]  ;;  %v440_v41 = vld [vmem:[%s921_s3 + $0x18] sm:$0xff]  ;;  %v439_v42 = vld [vmem:[%s921_s3 + $0x10] sm:$0xff] }
   0xf   :  { %625 = vmatpush3.bf16.msra.mxu0 %v702_v8  ;;  %687 = vmatpush3.bf16.msra.mxu1 %v702_v8  ;;  %v442_v43 = vld [vmem:[%s921_s3 + $0x28] sm:$0xff]  ;;  %v441_v44 = vld [vmem:[%s921_s3 + $0x20] sm:$0xff]  ;;  %v444_v45 = vld [vmem:[%s921_s3 + $0x38] sm:$0xff] }
  0x10   :  { %626 = vmatprep.subr.bf16.mxu0 %v703_v9  ;;  %680 = vmatprep.subr.bf16.mxu1 %v703_v9  ;;  %v443_v46 = vld [vmem:[%s921_s3 + $0x30] sm:$0xff] }
  0x11   :  { %416 = vperm.xlu1 %694, %v386_v29   ;;  %411 = vperm.xlu0 %693, %v385_v30  }
  0x13   :  { %627 = vmatpush3.bf16.msra.mxu0 %v704_v10  ;;  %688 = vmatpush3.bf16.msra.mxu1 %v704_v10 }
  0x14   :  { %628 = vmatprep.subr.bf16.mxu0 %v705_v11  ;;  %681 = vmatprep.subr.bf16.mxu1 %v705_v11 }
  0x15   :  { %426 = vperm.xlu1 %694, %v388_v33   ;;  %421 = vperm.xlu0 %693, %v387_v34  }
  0x17   :  { %629 = vmatpush3.bf16.msra.mxu0 %v706_v14  ;;  %689 = vmatpush3.bf16.msra.mxu1 %v706_v14 }
  0x18   :  { %630 = vmatprep.subr.bf16.mxu0 %v707_v15  ;;  %682 = vmatprep.subr.bf16.mxu1 %v707_v15 }
  0x19   :  { %452 = vperm.xlu1 %694, %v438_v37   ;;  %447 = vperm.xlu0 %693, %v437_v38  }
  0x1b   :  { %631 = vmatpush3.bf16.msra.mxu0 %v708_v16  ;;  %690 = vmatpush3.bf16.msra.mxu1 %v708_v16 }
  0x1c   :  { %632 = vmatprep.subr.bf16.mxu0 %v709_v17  ;;  %683 = vmatprep.subr.bf16.mxu1 %v709_v17 }
  0x1d   :  { %462 = vperm.xlu1 %694, %v440_v41   ;;  %457 = vperm.xlu0 %693, %v439_v42  }
  0x1f   :  { %633 = vmatpush3.bf16.msra.mxu0 %v710_v18  ;;  %691 = vmatpush3.bf16.msra.mxu1 %v710_v18 }
  0x20   :  { %664 = vmatprep.subr.bf16.mxu1 %v717_v21 }
  0x21   :  { %472 = vperm.xlu1 %694, %v442_v43   ;;  %467 = vperm.xlu0 %693, %v441_v44  }
  0x22   :  { %284 = vmatmul.mubr.bf16.vlgmr.msra.gmra.mrb[0].mxu0 %v711_v22  ;;  %308 = vmatmul.mubr.bf16.vlgmr.msra.gmra.mrb[0].mxu1 %v714_v23 }
  0x23   :  { %665 = vmatpush3.bf16.msra.mxu1 %v717_v21  ;;  %291 = vmatprep.mubr.bf16.mxu0 %v719_v26 }
  0x24   :  { %666 = vmatprep.subr.bf16.mxu1 %v718_v27  ;;  %668 = vmatprep.mubr.msk.bf16.mxu1 %vm238_vm0, %v721_v28 }
  0x25   :  { %482 = vperm.xlu1 %694, %v444_v45   ;;  %477 = vperm.xlu0 %693, %v443_v46  }
  0x27   :  { %667 = vmatpush3.bf16.msra.mxu1 %v718_v27 }
  0x2a   :  { %292 = vmatmul.mubr.bf16.gmra.mrb[4].mxu0 %v722_v31  ;;  %669 = vmatmul.mubr.msk.bf16.vlgmr.msra.gmra.mrb[4].mxu1 %vm238_vm0, %v723_v32 }
  0x2b   :  { %299 = vmatprep.mubr.bf16.mxu0 %v724_v35  ;;  %672 = vmatprep.mubr.msk.bf16.mxu1 %vm238_vm0, %v726_v36 }
  0x32   :  { %300 = vmatmul.mubr.bf16.gmra.mrb[8].mxu0 %v727_v39  ;;  %673 = vmatmul.mubr.msk.bf16.gmra.mrb[8].mxu1 %vm238_vm0, %v728_v40 }
  0x88   :  { %v402_v47 = vpop.permute.xlu1 %401  ;;  %v392_v48 = vpop.permute.xlu0 %391 }
  0x8c   :  { %v407_v49 = vpop.permute.xlu1 %406  ;;  %v397_v50 = vpop.permute.xlu0 %396 }
  0x90   :  { %v897_v51 = vpop.permute.xlu1 %416  ;;  %v899_v52 = vpop.permute.xlu0 %411 }
  0x94   :  { %v901_v53 = vpop.permute.xlu1 %426  ;;  %v422_v54 = vpop.permute.xlu0 %421 }
  0x98   :  { %v453_v55 = vpop.permute.xlu1 %452  ;;  %v448_v56 = vpop.permute.xlu0 %447 }
  0x9c   :  { %v463_v5 = vpop.permute.xlu1 %462  ;;  %v458_v6 = vpop.permute.xlu0 %457 }
  0xa0   :  { %v468_v21 = vpop.permute.xlu0 %467  ;;  %v473_v26 = vpop.permute.xlu1 %472 }
  0xa4   :  { %v478_v46 = vpop.permute.xlu0 %477 }
  0xf5   :  { %v634_v57 = vpop.f32.mrb[0].mxu0  ;;  %v652_v58 = vpop.f32.mrb[0].mxu1 }
  0xf6   :  { %v635_v59 = vpop.f32.mrb[1].mxu0  ;;  %v653_v60 = vpop.f32.mrb[1].mxu1 }
  0xf7   :  { %v636_v61 = vadd.f32 %v635_v59, %v634_v57  ;;  %v654_v62 = vadd.f32 %v653_v60, %v652_v58  ;;  %v637_v63 = vpop.f32.mrb[2].mxu0  ;;  %v655_v0 = vpop.f32.mrb[2].mxu1 }
  0xf8   :  { %v638_v1 = vpop.f32.mrb[3].mxu0  ;;  %v656_v2 = vpop.f32.mrb[3].mxu1 }
  0xf9   :  { %v639_v3 = vadd.f32 %v638_v1, %v637_v63  ;;  %v657_v4 = vadd.f32 %v656_v2, %v655_v0  ;;  %v483_v57 = vpop.permute.xlu1 %482 }
  0xfd   :  { %v640_v7 = vpop.f32.mrb[4].mxu0  ;;  %v670_v8 = vpop.f32.mrb[4].mxu1 }
  0xfe   :  { %v641_v9 = vpop.f32.mrb[5].mxu0  ;;  %v350_v10 = vpop.f32.mrb[5].mxu1 }
  0xff   :  { %v642_v11 = vadd.f32 %v641_v9, %v640_v7  ;;  %v351_v12 = vadd.f32 %v636_v61, %v350_v10  ;;  %v643_v13 = vpop.f32.mrb[6].mxu0  ;;  %v671_v14 = vpop.f32.mrb[6].mxu1 }
 0x100   :  { %v644_v15 = vpop.f32.mrb[7].mxu0  ;;  %v353_v16 = vpop.f32.mrb[7].mxu1 }
 0x101   :  { %v359_v17 = vadd.f32 %v670_v8, %v642_v11  ;;  %v429_v18 = vmul.f32 %v392_v48, %v351_v12  ;;  %v645_v19 = vadd.f32 %v644_v15, %v643_v13  ;;  %v354_v20 = vadd.f32 %v639_v3, %v353_v16 }
 0x103   :  { %v431_v22 = vmul.f32 %v402_v47, %v359_v17  ;;  %v485_v23 = vadd.f32 %v448_v56, %v429_v18  ;;  %v362_v24 = vadd.f32 %v671_v14, %v645_v19  ;;  %v430_v25 = vmul.f32 %v397_v50, %v354_v20 }
 0x105   :  { %v487_v27 = vadd.f32 %v458_v6, %v431_v22  ;;  %v432_v28 = vmul.f32 %v407_v49, %v362_v24  ;;  %v486_v29 = vadd.f32 %v453_v55, %v430_v25  ;;  %v646_v30 = vpop.f32.mrb[8].mxu0  ;;  %v674_v31 = vpop.f32.mrb[8].mxu1  ;;  %v493_v35 = vmax.f32 %v485_v23, 0.0 }
 0x106   :  { %v375_v32 = vadd.f32 %v674_v31, %v654_v62  ;;  %v647_v33 = vpop.f32.mrb[9].mxu0  ;;  %v366_v34 = vpop.f32.mrb[9].mxu1 }
 0x107   :  { %v488_v36 = vadd.f32 %v463_v5, %v432_v28  ;;  %v494_v37 = vmax.f32 %v486_v29, 0.0  ;;  %v648_v38 = vadd.f32 %v647_v33, %v646_v30  ;;  %v649_v39 = vpop.f32.mrb[10].mxu0  ;;  %v675_v40 = vpop.f32.mrb[10].mxu1  ;;  %v495_v41 = vmax.f32 %v487_v27, 0.0 }
 0x108   :  { %v435_v42 = vmul.f32 %v422_v54, %v375_v32  ;;  %v378_v43 = vadd.f32 %v675_v40, %v657_v4  ;;  %v650_v44 = vpop.f32.mrb[11].mxu0  ;;  %v369_v45 = vpop.f32.mrb[11].mxu1 }
 0x109   :  { %v496_v47 = vmax.f32 %v488_v36, 0.0  ;;  %v598_v48 = vpack.c.bf16 %v494_v37, %v493_v35  ;;  %v367_v49 = vadd.f32 %v648_v38, %v366_v34  ;;  %v651_v50 = vadd.f32 %v650_v44, %v649_v39 }
 0x10a   :  { %v491_v55 = vadd.f32 %v478_v46, %v435_v42  ;;  %v436_v56 = vmul.f32 %v901_v53, %v378_v43 }
 0x10b   :  { %v603_v58 = vpack.c.bf16 %v496_v47, %v495_v41  ;;  %599 = vst [vmem:[%s922_s4] sm:$0xff] %v598_v48   ;;  %v433_v59 = vmul.f32 %v899_v52, %v367_v49  ;;  %v370_v54 = vadd.f32 %v651_v50, %v369_v45 }
 0x10c   :  { %v492_v60 = vadd.f32 %v483_v57, %v436_v56  ;;  %v499_v63 = vmax.f32 %v491_v55, 0.0 }
 0x10d   :  { %615 = vst [vmem:[%s922_s4 + $0x8] sm:$0xff] %v603_v58   ;;  %v489_v61 = vadd.f32 %v468_v21, %v433_v59  ;;  %v434_v62 = vmul.f32 %v897_v51, %v370_v54 }
 0x10e   :  { %v500_v0 = vmax.f32 %v492_v60, 0.0 }
 0x10f   :  { %v490_v53 = vadd.f32 %v473_v26, %v434_v62  ;;  %v497_v2 = vmax.f32 %v489_v61, 0.0 }
 0x110   :  { %v613_v1 = vpack.c.bf16 %v500_v0, %v499_v63 }
 0x111   :  { %v498_v3 = vmax.f32 %v490_v53, 0.0 }
 0x112   :  { %617 = vst [vmem:[%s922_s4 + $0x18] sm:$0xff] %v613_v1  }
 0x113   :  { %v608_v52 = vpack.c.bf16 %v498_v3, %v497_v2 }
 0x115   :  { %616 = vst [vmem:[%s922_s4 + $0x10] sm:$0xff] %v608_v52  }

// kernel: generator_forward.7
= control target key start
LH: loop header
LB: loop body
LE: loop exit
PB: predicated region body
PF: predicated region fallthrough
CT: control target
= control target key end

     0   :  { %v504_v1 = vmov 0   ;;  %vm245_vm0 = vcmask 130048   ;;  %s653_s1 = inlined_call_operand.vmem [shape: bf16[144,512], index: 1, kind: input, shape index: {}]   ;;  %s654_s0 = inlined_call_operand.vmem [shape: bf16[4,144], index: 0, kind: input, shape index: {}]   ;;  %s655_s2 = inlined_call_operand.vmem [shape: f32[4,1], index: 2, kind: input, shape index: {}]   ;;  %s656_s3 = inlined_call_operand.vmem [shape: f32[4,1], index: 3, kind: input, shape index: {}]   ;;  %s657_s4 = inlined_call_operand.vmem [shape: f32[4,512], index: 4, kind: output, shape index: {}]  }
   0x1   :  { %v434_v0 = vld [vmem:[%s653_s1 + $0x4] ss:$16 sps:$4 sm:$0xff]   ;;  %433 = vset.pattern.permute.xlu0 %v504_v1  ;;  %v436_v2 = vld [vmem:[%s653_s1 + $0xc] ss:$16 sps:$4 sm:$0xff]   ;;  %v438_v3 = vld [vmem:[%s653_s1] ss:$16 sps:$4 sm:$0xff]  }
   0x2   :  { %249 = vmatprep.subr.bf16.mxu0 %v434_v0  ;;  %v439_v4 = vld [vmem:[%s653_s1 + $0x8] ss:$16 sps:$4 sm:$0xff]   ;;  %290 = vmatprep.subr.bf16.mxu1 %v436_v2  ;;  %v440_v5 = vld [vmem:[%s653_s1 + $0x24] ss:$16 sps:$4 sm:$0xff]   ;;  %v442_v6 = vld [vmem:[%s653_s1 + $0x2c] ss:$16 sps:$4 sm:$0xff]  }
   0x3   :  { %250 = vmatpush1.bf16.msra.mxu0 %v438_v3  ;;  %291 = vmatpush1.bf16.msra.mxu1 %v439_v4  ;;  %v444_v7 = vld [vmem:[%s653_s1 + $0x20] ss:$16 sps:$4 sm:$0xff]   ;;  %v445_v8 = vld [vmem:[%s653_s1 + $0x28] ss:$16 sps:$4 sm:$0xff]   ;;  %v446_v9 = vld [vmem:[%s653_s1 + $0x44] ss:$16 sps:$4 sm:$0xff]  }
   0x4   :  { %251 = vmatprep.subr.bf16.mxu0 %v440_v5  ;;  %292 = vmatprep.subr.bf16.mxu1 %v442_v6  ;;  %v448_v10 = vld [vmem:[%s653_s1 + $0x4c] ss:$16 sps:$4 sm:$0xff]   ;;  %v450_v11 = vld [vmem:[%s653_s1 + $0x40] ss:$16 sps:$4 sm:$0xff]   ;;  %v451_v12 = vld [vmem:[%s653_s1 + $0x48] ss:$16 sps:$4 sm:$0xff]  }
   0x5   :  { %v452_v13 = vld [vmem:[%s653_s1 + $0x64] ss:$16 sps:$4 sm:$0xff]   ;;  %v454_v14 = vld [vmem:[%s653_s1 + $0x6c] ss:$16 sps:$4 sm:$0xff]   ;;  %v456_v15 = vld [vmem:[%s653_s1 + $0x60] ss:$16 sps:$4 sm:$0xff]  }
   0x6   :  { %v457_v16 = vld [vmem:[%s653_s1 + $0x68] ss:$16 sps:$4 sm:$0xff]   ;;  %v458_v17 = vld [vmem:[%s653_s1 + $0x84] ss:$16 sps:$4 sm:$0xff]   ;;  %v460_v18 = vld [vmem:[%s653_s1 + $0x8c] ss:$16 sps:$4 sm:$0xff]  }
   0x7   :  { %252 = vmatpush1.bf16.msra.mxu0 %v444_v7  ;;  %293 = vmatpush1.bf16.msra.mxu1 %v445_v8  ;;  %v462_v19 = vld [vmem:[%s653_s1 + $0x80] ss:$16 sps:$4 sm:$0xff]   ;;  %v463_v20 = vld [vmem:[%s653_s1 + $0x88] ss:$16 sps:$4 sm:$0xff]   ;;  %v464_v21 = vld [vmem:[%s653_s1 + $0xa4] ss:$16 sps:$4 sm:$0xff]  }
   0x8   :  { %253 = vmatprep.subr.bf16.mxu0 %v446_v9  ;;  %294 = vmatprep.subr.bf16.mxu1 %v448_v10  ;;  %v466_v22 = vld [vmem:[%s653_s1 + $0xac] ss:$16 sps:$4 sm:$0xff]   ;;  %v468_v23 = vld [vmem:[%s653_s1 + $0xa0] ss:$16 sps:$4 sm:$0xff]   ;;  %v469_v24 = vld [vmem:[%s653_s1 + $0xa8] ss:$16 sps:$4 sm:$0xff]  }
   0x9   :  { %v470_v25 = vld [vmem:[%s653_s1 + $0xc4] ss:$16 sps:$4 sm:$0xff]   ;;  %v472_v26 = vld [vmem:[%s653_s1 + $0xcc] ss:$16 sps:$4 sm:$0xff]   ;;  %v474_v27 = vld [vmem:[%s653_s1 + $0xc0] ss:$16 sps:$4 sm:$0xff]  }
   0xa   :  { %v475_v28 = vld [vmem:[%s653_s1 + $0xc8] ss:$16 sps:$4 sm:$0xff]   ;;  %v389_v29 = vld.sshfl [vmem:[%s654_s0] sm:$0x33 pattern:$0x76325410] }
   0xb   :  { %254 = vmatpush1.bf16.msra.mxu0 %v450_v11  ;;  %295 = vmatpush1.bf16.msra.mxu1 %v451_v12  ;;  %v331_v30 = vld [vmem:[%s655_s2] sm:$0xf]  ;;  %v476_v31 = vld [vmem:[%s653_s1 + $0xe4] ss:$16 sps:$4 sm:$0xff]   ;;  %v478_v32 = vld [vmem:[%s653_s1 + $0xec] ss:$16 sps:$4 sm:$0xff]   ;;  %v63_v33 = vcombine.high %v389_v29, %v389_v29 }
   0xc   :  { %255 = vmatprep.subr.bf16.mxu0 %v452_v13  ;;  %296 = vmatprep.subr.bf16.mxu1 %v454_v14  ;;  %v341_v34 = vld [vmem:[%s656_s3] sm:$0xf]  ;;  %v481_v36 = vld [vmem:[%s653_s1 + $0xe8] ss:$16 sps:$4 sm:$0xff]   ;;  %v482_v37 = vld [vmem:[%s653_s1 + $0x104] ss:$16 sps:$4 sm:$0xff]  }
   0xd   :  { %334 = vperm.xlu0 %433, %v331_v30   ;;  %426 = vmatprep.mubr.msk.bf16.mxu0 %vm245_vm0, %v63_v33  ;;  %v480_v35 = vld [vmem:[%s653_s1 + $0xe0] ss:$16 sps:$4 sm:$0xff]   ;;  %v484_v38 = vld [vmem:[%s653_s1 + $0x10c] ss:$16 sps:$4 sm:$0xff]   ;;  %v487_v40 = vld [vmem:[%s653_s1 + $0x108] ss:$16 sps:$4 sm:$0xff]  }
   0xe   :  { %427 = vmatprep.mubr.msk.bf16.mxu1 %vm245_vm0, %v63_v33  ;;  %v486_v39 = vld [vmem:[%s653_s1 + $0x100] ss:$16 sps:$4 sm:$0xff]  }
   0xf   :  { %256 = vmatpush1.bf16.msra.mxu0 %v456_v15  ;;  %297 = vmatpush1.bf16.msra.mxu1 %v457_v16 }
  0x10   :  { %257 = vmatprep.subr.bf16.mxu0 %v458_v17  ;;  %298 = vmatprep.subr.bf16.mxu1 %v460_v18 }
  0x11   :  { %344 = vperm.xlu0 %433, %v341_v34  }
  0x13   :  { %258 = vmatpush1.bf16.msra.mxu0 %v462_v19  ;;  %299 = vmatpush1.bf16.msra.mxu1 %v463_v20 }
  0x14   :  { %259 = vmatprep.subr.bf16.mxu0 %v464_v21  ;;  %300 = vmatprep.subr.bf16.mxu1 %v466_v22 }
  0x17   :  { %260 = vmatpush1.bf16.msra.mxu0 %v468_v23  ;;  %301 = vmatpush1.bf16.msra.mxu1 %v469_v24 }
  0x18   :  { %261 = vmatprep.subr.bf16.mxu0 %v470_v25  ;;  %302 = vmatprep.subr.bf16.mxu1 %v472_v26 }
  0x1b   :  { %262 = vmatpush1.bf16.msra.mxu0 %v474_v27  ;;  %303 = vmatpush1.bf16.msra.mxu1 %v475_v28 }
  0x1c   :  { %263 = vmatprep.subr.bf16.mxu0 %v476_v31  ;;  %304 = vmatprep.subr.bf16.mxu1 %v478_v32 }
  0x1f   :  { %264 = vmatpush1.bf16.msra.mxu0 %v480_v35  ;;  %305 = vmatpush1.bf16.msra.mxu1 %v481_v36 }
  0x20   :  { %265 = vmatprep.subr.bf16.mxu0 %v482_v37  ;;  %306 = vmatprep.subr.bf16.mxu1 %v484_v38 }
  0x23   :  { %266 = vmatpush1.bf16.msra.mxu0 %v486_v39  ;;  %307 = vmatpush1.bf16.msra.mxu1 %v487_v40 }
  0x26   :  { %282 = vmatmul.mubr.bf16.vlgmr.msra.gmra.mrb[0].mxu0 %v389_v29  ;;  %323 = vmatmul.mubr.bf16.vlgmr.msra.gmra.mrb[0].mxu1 %v389_v29 }
  0x8c   :  { %v335_v41 = vpop.permute.xlu0 %334 }
  0x90   :  { %v345_v42 = vpop.permute.xlu0 %344 }
  0xf9   :  { %v283_v43 = vpop.f32.mrb[0].mxu0  ;;  %v324_v44 = vpop.f32.mrb[0].mxu1 }
  0xfa   :  { %v337_v45 = vmul.f32 %v335_v41, %v283_v43  ;;  %v339_v46 = vmul.f32 %v335_v41, %v324_v44  ;;  %v285_v47 = vpop.f32.mrb[1].mxu0  ;;  %v326_v48 = vpop.f32.mrb[1].mxu1 }
  0xfb   :  { %v338_v49 = vmul.f32 %v335_v41, %v285_v47  ;;  %v340_v50 = vmul.f32 %v335_v41, %v326_v48  ;;  %v287_v51 = vpop.f32.mrb[2].mxu0  ;;  %v328_v52 = vpop.f32.mrb[2].mxu1 }
  0xfc   :  { %v347_v53 = vadd.f32 %v345_v42, %v337_v45  ;;  %v349_v54 = vadd.f32 %v345_v42, %v339_v46  ;;  %v288_v55 = vpop.f32.mrb[3].mxu0  ;;  %v329_v56 = vpop.f32.mrb[3].mxu1 }
  0xfd   :  { %v348_v57 = vadd.f32 %v345_v42, %v338_v49  ;;  %v350_v58 = vadd.f32 %v345_v42, %v340_v50 }
  0xfe   :  { %v428_v59 = vmul.f32 -1.442695, %v347_v53  ;;  %v430_v60 = vmul.f32 -1.442695, %v349_v54 }
  0xff   :  { %v429_v61 = vmul.f32 -1.442695, %v348_v57  ;;  %v431_v62 = vmul.f32 -1.442695, %v350_v58 }
 0x100   :  { %488 = vpow2.f32 %v428_v59 }
 0x101   :  { %490 = vpow2.f32 %v430_v60 }
 0x102   :  { %492 = vpow2.f32 %v429_v61 }
 0x103   :  { %494 = vpow2.f32 %v431_v62 }
 0x10a   :  { %v489_v63 = vpop.eup %488 }
 0x10b   :  { %v491_v0 = vpop.eup %490  ;;  %v363_v1 = vadd.f32 1.0, %v489_v63 }
 0x10c   :  { %v493_v2 = vpop.eup %492  ;;  %v365_v3 = vadd.f32 1.0, %v491_v0 }
 0x10d   :  { %v495_v4 = vpop.eup %494  ;;  %496 = vrcp.f32 %v363_v1  ;;  %v364_v5 = vadd.f32 1.0, %v493_v2 }
 0x10e   :  { %498 = vrcp.f32 %v365_v3  ;;  %v366_v6 = vadd.f32 1.0, %v495_v4 }
 0x10f   :  { %500 = vrcp.f32 %v364_v5 }
 0x110   :  { %502 = vrcp.f32 %v366_v6 }
 0x117   :  { %v497_v7 = vpop.eup %496 }
 0x118   :  { %v499_v8 = vpop.eup %498 }
 0x119   :  { %v501_v9 = vpop.eup %500 }
 0x11a   :  { %v503_v10 = vpop.eup %502  ;;  %v379_v11 = vcombine.low %v497_v7, %v501_v9 }
 0x11b   :  { %v380_v12 = vcombine.low %v499_v8, %v503_v10 }
 0x11c   :  { %383 = vst [vmem:[%s657_s4] sm:$0xff] %v379_v11 }
 0x11d   :  { %384 = vst [vmem:[%s657_s4 + $0x8] sm:$0xff] %v380_v12 }

</bundles_post_ra>
